<compile_context>
chip_gen: v7x
topology: tpu7x:2x2x1
jax: 0.10.0
libtpu: 0.0.40
codegen_flags: <defaults>
</compile_context>

<pallas_src>
import functools

import jax
import jax.numpy as jnp
import numpy as np
from jax.experimental import pallas as pl
from jax.experimental.pallas import tpu as pltpu

BN_EPS = 1e-5
K_SIZE = 15
STRIDE = 7
PAD = 7


def conv_out_len(length, k=K_SIZE, s=STRIDE, p=PAD):
    return (length + 2 * p - k) // s + 1


# ----------------------------- Pallas kernel --------------------------------
def _mscnn_kernel(x_ref, w1_ref, b1_ref, w2_ref, b2_ref, w3_ref, b3_ref,
                  fc1w_ref, fc1b_ref, fc3w_ref, fc3b_ref, outw_ref, outb_ref,
                  o_ref, *, num_stream, batch, l1, l2):
    c1 = w1_ref.shape[-1]
    zero_c1 = jnp.zeros((batch, c1), jnp.float32)
    feats = []
    for s in range(num_stream):
        xs = x_ref[s]                         # [B, L + 2*PAD]  (pre-padded signal)
        w1, b1 = w1_ref[s], b1_ref[s]         # [K, C1],    [1, C1]
        w2, b2 = w2_ref[s], b2_ref[s]         # [K*C1, C2], [1, C2]
        w3, b3 = w3_ref[s], b3_ref[s]         # [C2, C3],   [1, C3]

        # conv1 + folded BN + ReLU: in-kernel im2col -- one static lane-slice
        # window and one MXU matmul per output position, all in VMEM/vregs.
        h1 = [
            jnp.maximum(
                jnp.dot(xs[:, STRIDE * l:STRIDE * l + K_SIZE], w1,
                        preferred_element_type=jnp.float32) + b1, 0.0)
            for l in range(l1)
        ]
        # zero-padding along the length axis for conv2
        h1 = [zero_c1] * PAD + h1 + [zero_c1] * PAD

        outs = []
        for m in range(l2):
            # conv2 patch (tap-major, channel-minor) assembled by lane concat.
            patch = jnp.concatenate([h1[STRIDE * m + t] for t in range(K_SIZE)],
                                    axis=-1)                     # [B, K*C1]
            h2 = jnp.maximum(
                jnp.dot(patch, w2, preferred_element_type=jnp.float32) + b2, 0.0)
            # conv3 is a 1x1 conv -> chain its matmul directly onto h2.
            h3 = jnp.maximum(
                jnp.dot(h2, w3, preferred_element_type=jnp.float32) + b3, 0.0)
            outs.append(h3)                                      # [B, C3]
        # Per-stream features with columns ordered (position, channel); the fc1
        # weight rows were pre-permuted in the wrapper to match this order.
        feats.append(jnp.concatenate(outs, axis=-1))             # [B, l2*C3]
        # TODO(synk): Dropout layers are inference-mode identity (no RNG mask).

    feat = jnp.concatenate(feats, axis=-1)                       # [B, featDim]
    h = jnp.maximum(
        jnp.dot(feat, fc1w_ref[...], preferred_element_type=jnp.float32)
        + fc1b_ref[...], 0.0)
    h = jnp.maximum(
        jnp.dot(h, fc3w_ref[...], preferred_element_type=jnp.float32)
        + fc3b_ref[...], 0.0)
    o_ref[...] = (jnp.dot(h, outw_ref[...], preferred_element_type=jnp.float32)
                  + outb_ref[...]).astype(o_ref.dtype)


def _full_spec(shape):
    rank = len(shape)
    return pl.BlockSpec(tuple(shape), lambda i, _r=rank: (0,) * _r)


def mscnn_forward(x, packed, cfg):
    batch = x.shape[0]
    length = x.shape[-1]
    num_stream = cfg["num_stream"]
    l1 = conv_out_len(length)
    l2 = conv_out_len(l1)

    # [B, 1, S, L] -> [S, B, L] -> zero-pad the length axis once for conv1.
    x_s = jnp.transpose(x[:, 0, :, :], (1, 0, 2))
    x_pad = jnp.pad(x_s, ((0, 0), (0, 0), (PAD, PAD)))

    args = (x_pad,
            packed["w1"], packed["b1"], packed["w2"], packed["b2"],
            packed["w3"], packed["b3"],
            packed["fc1_w"], packed["fc1_b"],
            packed["fc3_w"], packed["fc3_b"],
            packed["out_w"], packed["out_b"])

    kernel = functools.partial(_mscnn_kernel, num_stream=num_stream,
                               batch=batch, l1=l1, l2=l2)
    out_shape = jax.ShapeDtypeStruct((batch, cfg["num_classes"]), jnp.float32)
    # Whole problem fits trivially in VMEM -> single grid step, single launch.
    # TODO(synk): for large batch, add an M grid axis marked "parallel" so
    # v7x's two TensorCores split the rows, and re-budget tiles for 64 MiB VMEM.
    return pl.pallas_call(
        kernel,
        out_shape=out_shape,
        grid=(1,),
        in_specs=[_full_spec(a.shape) for a in args],
        out_specs=_full_spec(out_shape.shape),
        compiler_params=pltpu.CompilerParams(dimension_semantics=("arbitrary",)),
    )(*args)


# ------------------------- BN folding / param packing ------------------------
def _fold_bn_conv(p):
    scale = p["gamma"] / jnp.sqrt(p["var"] + BN_EPS)
    w_eff = p["w"] * scale[:, None, None]                 # [Cout, Cin, K]
    b_eff = (p["b"] - p["mean"]) * scale + p["beta"]
    return w_eff, b_eff


def _fold_bn_linear(p):
    if "gamma" not in p:
        return p["w"], p["b"]
    scale = p["gamma"] / jnp.sqrt(p["var"] + BN_EPS)
    return p["w"] * scale[:, None], (p["b"] - p["mean"]) * scale + p["beta"]


def pack_params(raw, cfg):
    """Fold eval-mode BN, convert to kernel matmul layout, stack per stream."""
    num_stream = cfg["num_stream"]
    packed = {}
    for i, name in enumerate(("conv1", "conv2", "conv3"), start=1):
        w_mats, b_mats = [], []
        for s in range(num_stream):
            w_eff, b_eff = _fold_bn_conv(raw["streams"][s][name])
            cout, cin, k = w_eff.shape
            # kernel matmul layout: rows ordered (tap t major, input channel minor)
            w_mats.append(jnp.transpose(w_eff, (2, 1, 0)).reshape(k * cin, cout))
            b_mats.append(b_eff.reshape(1, cout))
        packed[f"w{i}"] = jnp.stack(w_mats)                # [S, K*Cin, Cout]
        packed[f"b{i}"] = jnp.stack(b_mats)                # [S, 1, Cout]

    l2 = conv_out_len(conv_out_len(cfg["L"]))
    c3 = cfg["filter3"]

    w_eff, b_eff = _fold_bn_linear(raw["fc1"])
    w_fc1 = w_eff.T                                        # [featDim (torch order), F1]
    f1 = w_fc1.shape[1]
    # Torch flatten per stream is (channel major, position minor); the kernel
    # emits (position major, channel minor) -> permute fc1 input rows to match.
    w_fc1 = jnp.transpose(w_fc1.reshape(num_stream, c3, l2, f1),
                          (0, 2, 1, 3)).reshape(num_stream * l2 * c3, f1)
    packed["fc1_w"], packed["fc1_b"] = w_fc1, b_eff.reshape(1, -1)

    w_eff, b_eff = _fold_bn_linear(raw["fc3"])
    packed["fc3_w"], packed["fc3_b"] = w_eff.T, b_eff.reshape(1, -1)
    w_eff, b_eff = _fold_bn_linear(raw["out"])
    packed["out_w"], packed["out_b"] = w_eff.T, b_eff.reshape(1, -1)
    return packed


# ------------------------------ parameter init --------------------------------
def init_raw_params(key, cfg):
    def nrm(k, shape, scale=0.1):
        return scale * jax.random.normal(k, shape, dtype=jnp.float32)

    keys = iter(jax.random.split(key, 128))
    conv_defs = [(1, cfg["filter1"], 15),
                 (cfg["filter1"], cfg["filter2"], 15),
                 (cfg["filter2"], cfg["filter3"], 1)]
    raw = {"streams": []}
    for _ in range(cfg["num_stream"]):
        stream = {}
        for name, (cin, cout, k) in zip(("conv1", "conv2", "conv3"), conv_defs):
            stream[name] = dict(
                w=nrm(next(keys), (cout, cin, k)),
                b=nrm(next(keys), (cout,)),
                gamma=1.0 + nrm(next(keys), (cout,)),
                beta=nrm(next(keys), (cout,)),
                mean=nrm(next(keys), (cout,)),
                var=0.5 + jax.random.uniform(next(keys), (cout,), dtype=jnp.float32),
            )
        raw["streams"].append(stream)

    def linear(din, dout, with_bn):
        p = dict(w=nrm(next(keys), (dout, din)), b=nrm(next(keys), (dout,)))
        if with_bn:
            p.update(
                gamma=1.0 + nrm(next(keys), (dout,)),
                beta=nrm(next(keys), (dout,)),
                mean=nrm(next(keys), (dout,)),
                var=0.5 + jax.random.uniform(next(keys), (dout,), dtype=jnp.float32),
            )
        return p

    raw["fc1"] = linear(cfg["featDim_concat"], cfg["fc1"], True)
    raw["fc3"] = linear(cfg["fc1"], cfg["fc3"], True)
    raw["out"] = linear(cfg["fc3"], cfg["num_classes"], False)
    return raw


# ------------------------- pure-JAX reference (eval mode) ---------------------
def _ref_conv_bn_relu(h_nlc, p, k, stride, pad):
    batch, length, cin = h_nlc.shape
    w_eff, b_eff = _fold_bn_conv(p)
    cout = w_eff.shape[0]
    xp = jnp.pad(h_nlc, ((0, 0), (pad, pad), (0, 0)))
    l_out = (length + 2 * pad - k) // stride + 1
    cols = []
    for t in range(k):
        end = t + stride * (l_out - 1) + 1
        cols.append(xp[:, t:end:stride, :])                 # [B, L_out, Cin]
    patches = jnp.stack(cols, axis=2)                       # [B, L_out, K, Cin]
    patches = jnp.transpose(patches, (0, 1, 3, 2)).reshape(batch * l_out, cin * k)
    y = jnp.dot(patches, w_eff.reshape(cout, cin * k).T,
                precision=jax.lax.Precision.HIGHEST) + b_eff
    return jnp.maximum(y, 0.0).reshape(batch, l_out, cout)


def _ref_linear(h, p, relu):
    w_eff, b_eff = _fold_bn_linear(p)
    y = jnp.dot(h, w_eff.T, precision=jax.lax.Precision.HIGHEST) + b_eff
    return jnp.maximum(y, 0.0) if relu else y


def reference_forward(x, raw, cfg):
    """Layer-by-layer eval-mode forward mirroring the PyTorch module."""
    batch = x.shape[0]
    feats = []
    for s in range(cfg["num_stream"]):
        h = jnp.transpose(x[:, :, s, :], (0, 2, 1))          # [B, L, 1]
        for name, k, st, pd in (("conv1", 15, 7, 7),
                                ("conv2", 15, 7, 7),
                                ("conv3", 1, 1, 0)):
            h = _ref_conv_bn_relu(h, raw["streams"][s][name], k, st, pd)
        feats.append(jnp.transpose(h, (0, 2, 1)).reshape(batch, -1))  # torch .view(B,-1)
    out = jnp.concatenate(feats, axis=1)
    out = _ref_linear(out, raw["fc1"], relu=True)
    out = _ref_linear(out, raw["fc3"], relu=True)
    return _ref_linear(out, raw["out"], relu=False)


# ----------------------------------- main -------------------------------------
if __name__ == "__main__":
    batch, length = 2, 98
    cfg = {
        "num_stream": 2,
        "filter1": 4,
        "filter2": 8,
        "filter3": 16,
        "fc1": 32,
        "fc3": 16,
        "num_classes": 4,
        "dropout_rate": 0.5,
        "L": length,
    }
    l1 = conv_out_len(length)          # 14
    l2 = conv_out_len(l1)              # 2
    cfg["featDim_concat"] = cfg["num_stream"] * cfg["filter3"] * l2   # 64

    key = jax.random.PRNGKey(0)
    k_x, k_p = jax.random.split(key)
    x = jax.random.normal(k_x, (batch, 1, cfg["num_stream"], length),
                          dtype=jnp.float32)

    raw = init_raw_params(k_p, cfg)
    packed = pack_params(raw, cfg)

    fwd = jax.jit(functools.partial(mscnn_forward, cfg=cfg))
    logits = fwd(x, packed)
    jax.block_until_ready(logits)
    assert logits.shape == (batch, cfg["num_classes"])

    # Cross-check the fused kernel against a straightforward pure-JAX reference.
    ref = reference_forward(x, raw, cfg)
    np.testing.assert_allclose(np.asarray(logits), np.asarray(ref),
                               rtol=2e-2, atol=2e-2)
    print("KERNEL_OK")
</pallas_src>

<mosaic_0001>
module attributes {stable_mosaic.version = 11 : i64} {
  func.func @_mscnn_kernel(%arg0: i32, %arg1: memref<2x2x112xf32, #tpu.memory_space<vmem>>, %arg2: memref<2x15x4xf32, #tpu.memory_space<vmem>>, %arg3: memref<2x1x4xf32, #tpu.memory_space<vmem>>, %arg4: memref<2x60x8xf32, #tpu.memory_space<vmem>>, %arg5: memref<2x1x8xf32, #tpu.memory_space<vmem>>, %arg6: memref<2x8x16xf32, #tpu.memory_space<vmem>>, %arg7: memref<2x1x16xf32, #tpu.memory_space<vmem>>, %arg8: memref<64x32xf32, #tpu.memory_space<vmem>>, %arg9: memref<1x32xf32, #tpu.memory_space<vmem>>, %arg10: memref<32x16xf32, #tpu.memory_space<vmem>>, %arg11: memref<1x16xf32, #tpu.memory_space<vmem>>, %arg12: memref<16x4xf32, #tpu.memory_space<vmem>>, %arg13: memref<1x4xf32, #tpu.memory_space<vmem>>, %arg14: memref<2x4xf32, #tpu.memory_space<vmem>>) attributes {dimension_semantics = [#tpu.dimension_semantics<arbitrary>], iteration_bounds = array<i64: 1>, scalar_prefetch = 0 : i64, scratch_operands = 0 : i64, tpu.core_type = #tpu.core_type<tc>, window_params = [{pipeline_mode = #tpu.pipeline_mode<synchronous>, transform_indices = @transform_0, window_bounds = array<i64: 2, 2, 112>}, {pipeline_mode = #tpu.pipeline_mode<synchronous>, transform_indices = @transform_1, window_bounds = array<i64: 2, 15, 4>}, {pipeline_mode = #tpu.pipeline_mode<synchronous>, transform_indices = @transform_2, window_bounds = array<i64: 2, 1, 4>}, {pipeline_mode = #tpu.pipeline_mode<synchronous>, transform_indices = @transform_3, window_bounds = array<i64: 2, 60, 8>}, {pipeline_mode = #tpu.pipeline_mode<synchronous>, transform_indices = @transform_4, window_bounds = array<i64: 2, 1, 8>}, {pipeline_mode = #tpu.pipeline_mode<synchronous>, transform_indices = @transform_5, window_bounds = array<i64: 2, 8, 16>}, {pipeline_mode = #tpu.pipeline_mode<synchronous>, transform_indices = @transform_6, window_bounds = array<i64: 2, 1, 16>}, {pipeline_mode = #tpu.pipeline_mode<synchronous>, transform_indices = @transform_7, window_bounds = array<i64: 64, 32>}, {pipeline_mode = #tpu.pipeline_mode<synchronous>, transform_indices = @transform_8, window_bounds = array<i64: 1, 32>}, {pipeline_mode = #tpu.pipeline_mode<synchronous>, transform_indices = @transform_9, window_bounds = array<i64: 32, 16>}, {pipeline_mode = #tpu.pipeline_mode<synchronous>, transform_indices = @transform_10, window_bounds = array<i64: 1, 16>}, {pipeline_mode = #tpu.pipeline_mode<synchronous>, transform_indices = @transform_11, window_bounds = array<i64: 16, 4>}, {pipeline_mode = #tpu.pipeline_mode<synchronous>, transform_indices = @transform_12, window_bounds = array<i64: 1, 4>}, {pipeline_mode = #tpu.pipeline_mode<synchronous>, transform_indices = @transform_13, window_bounds = array<i64: 2, 4>}]} {
    %cst = arith.constant 0.000000e+00 : f32
    %0 = vector.broadcast %cst : f32 to vector<2x4xf32>
    %c0 = arith.constant 0 : index
    %c0_0 = arith.constant 0 : index
    %c0_1 = arith.constant 0 : index
    %1 = vector.load %arg1[%c0, %c0_0, %c0_1] : memref<2x2x112xf32, #tpu.memory_space<vmem>>, vector<1x2x112xf32>
    %2 = vector.shape_cast %1 : vector<1x2x112xf32> to vector<2x112xf32>
    %c0_2 = arith.constant 0 : index
    %c0_3 = arith.constant 0 : index
    %c0_4 = arith.constant 0 : index
    %3 = vector.load %arg2[%c0_2, %c0_3, %c0_4] : memref<2x15x4xf32, #tpu.memory_space<vmem>>, vector<1x15x4xf32>
    %4 = vector.shape_cast %3 : vector<1x15x4xf32> to vector<15x4xf32>
    %c0_5 = arith.constant 0 : index
    %c0_6 = arith.constant 0 : index
    %c0_7 = arith.constant 0 : index
    %5 = vector.load %arg3[%c0_5, %c0_6, %c0_7] : memref<2x1x4xf32, #tpu.memory_space<vmem>>, vector<1x1x4xf32>
    %6 = vector.shape_cast %5 : vector<1x1x4xf32> to vector<1x4xf32>
    %c0_8 = arith.constant 0 : index
    %c0_9 = arith.constant 0 : index
    %c0_10 = arith.constant 0 : index
    %7 = vector.load %arg4[%c0_8, %c0_9, %c0_10] : memref<2x60x8xf32, #tpu.memory_space<vmem>>, vector<1x60x8xf32>
    %8 = vector.shape_cast %7 : vector<1x60x8xf32> to vector<60x8xf32>
    %c0_11 = arith.constant 0 : index
    %c0_12 = arith.constant 0 : index
    %c0_13 = arith.constant 0 : index
    %9 = vector.load %arg5[%c0_11, %c0_12, %c0_13] : memref<2x1x8xf32, #tpu.memory_space<vmem>>, vector<1x1x8xf32>
    %10 = vector.shape_cast %9 : vector<1x1x8xf32> to vector<1x8xf32>
    %c0_14 = arith.constant 0 : index
    %c0_15 = arith.constant 0 : index
    %c0_16 = arith.constant 0 : index
    %11 = vector.load %arg6[%c0_14, %c0_15, %c0_16] : memref<2x8x16xf32, #tpu.memory_space<vmem>>, vector<1x8x16xf32>
    %12 = vector.shape_cast %11 : vector<1x8x16xf32> to vector<8x16xf32>
    %c0_17 = arith.constant 0 : index
    %c0_18 = arith.constant 0 : index
    %c0_19 = arith.constant 0 : index
    %13 = vector.load %arg7[%c0_17, %c0_18, %c0_19] : memref<2x1x16xf32, #tpu.memory_space<vmem>>, vector<1x1x16xf32>
    %14 = vector.shape_cast %13 : vector<1x1x16xf32> to vector<1x16xf32>
    %15 = vector.extract_strided_slice %2 {offsets = [0, 0], sizes = [2, 15], strides = [1, 1]} : vector<2x112xf32> to vector<2x15xf32>
    %cst_20 = arith.constant dense<0.000000e+00> : vector<2x4xf32>
    %16 = tpu.matmul %15, %4, %cst_20 {dimension_numbers = #tpu.dot_dimension_numbers<[1], [0], [0], [1], [0, 0, 1, 1], [], []>} : vector<2x15xf32>, vector<15x4xf32>, vector<2x4xf32> -> vector<2x4xf32>
    %17 = vector.broadcast %6 : vector<1x4xf32> to vector<2x4xf32>
    %18 = arith.addf %16, %17 : vector<2x4xf32>
    %cst_21 = arith.constant 0.000000e+00 : f32
    %19 = vector.broadcast %cst_21 : f32 to vector<2x4xf32>
    %20 = arith.maximumf %18, %19 : vector<2x4xf32>
    %21 = vector.extract_strided_slice %2 {offsets = [0, 7], sizes = [2, 15], strides = [1, 1]} : vector<2x112xf32> to vector<2x15xf32>
    %cst_22 = arith.constant dense<0.000000e+00> : vector<2x4xf32>
    %22 = tpu.matmul %21, %4, %cst_22 {dimension_numbers = #tpu.dot_dimension_numbers<[1], [0], [0], [1], [0, 0, 1, 1], [], []>} : vector<2x15xf32>, vector<15x4xf32>, vector<2x4xf32> -> vector<2x4xf32>
    %23 = vector.broadcast %6 : vector<1x4xf32> to vector<2x4xf32>
    %24 = arith.addf %22, %23 : vector<2x4xf32>
    %cst_23 = arith.constant 0.000000e+00 : f32
    %25 = vector.broadcast %cst_23 : f32 to vector<2x4xf32>
    %26 = arith.maximumf %24, %25 : vector<2x4xf32>
    %27 = vector.extract_strided_slice %2 {offsets = [0, 14], sizes = [2, 15], strides = [1, 1]} : vector<2x112xf32> to vector<2x15xf32>
    %cst_24 = arith.constant dense<0.000000e+00> : vector<2x4xf32>
    %28 = tpu.matmul %27, %4, %cst_24 {dimension_numbers = #tpu.dot_dimension_numbers<[1], [0], [0], [1], [0, 0, 1, 1], [], []>} : vector<2x15xf32>, vector<15x4xf32>, vector<2x4xf32> -> vector<2x4xf32>
    %29 = vector.broadcast %6 : vector<1x4xf32> to vector<2x4xf32>
    %30 = arith.addf %28, %29 : vector<2x4xf32>
    %cst_25 = arith.constant 0.000000e+00 : f32
    %31 = vector.broadcast %cst_25 : f32 to vector<2x4xf32>
    %32 = arith.maximumf %30, %31 : vector<2x4xf32>
    %33 = vector.extract_strided_slice %2 {offsets = [0, 21], sizes = [2, 15], strides = [1, 1]} : vector<2x112xf32> to vector<2x15xf32>
    %cst_26 = arith.constant dense<0.000000e+00> : vector<2x4xf32>
    %34 = tpu.matmul %33, %4, %cst_26 {dimension_numbers = #tpu.dot_dimension_numbers<[1], [0], [0], [1], [0, 0, 1, 1], [], []>} : vector<2x15xf32>, vector<15x4xf32>, vector<2x4xf32> -> vector<2x4xf32>
    %35 = vector.broadcast %6 : vector<1x4xf32> to vector<2x4xf32>
    %36 = arith.addf %34, %35 : vector<2x4xf32>
    %cst_27 = arith.constant 0.000000e+00 : f32
    %37 = vector.broadcast %cst_27 : f32 to vector<2x4xf32>
    %38 = arith.maximumf %36, %37 : vector<2x4xf32>
    %39 = vector.extract_strided_slice %2 {offsets = [0, 28], sizes = [2, 15], strides = [1, 1]} : vector<2x112xf32> to vector<2x15xf32>
    %cst_28 = arith.constant dense<0.000000e+00> : vector<2x4xf32>
    %40 = tpu.matmul %39, %4, %cst_28 {dimension_numbers = #tpu.dot_dimension_numbers<[1], [0], [0], [1], [0, 0, 1, 1], [], []>} : vector<2x15xf32>, vector<15x4xf32>, vector<2x4xf32> -> vector<2x4xf32>
    %41 = vector.broadcast %6 : vector<1x4xf32> to vector<2x4xf32>
    %42 = arith.addf %40, %41 : vector<2x4xf32>
    %cst_29 = arith.constant 0.000000e+00 : f32
    %43 = vector.broadcast %cst_29 : f32 to vector<2x4xf32>
    %44 = arith.maximumf %42, %43 : vector<2x4xf32>
    %45 = vector.extract_strided_slice %2 {offsets = [0, 35], sizes = [2, 15], strides = [1, 1]} : vector<2x112xf32> to vector<2x15xf32>
    %cst_30 = arith.constant dense<0.000000e+00> : vector<2x4xf32>
    %46 = tpu.matmul %45, %4, %cst_30 {dimension_numbers = #tpu.dot_dimension_numbers<[1], [0], [0], [1], [0, 0, 1, 1], [], []>} : vector<2x15xf32>, vector<15x4xf32>, vector<2x4xf32> -> vector<2x4xf32>
    %47 = vector.broadcast %6 : vector<1x4xf32> to vector<2x4xf32>
    %48 = arith.addf %46, %47 : vector<2x4xf32>
    %cst_31 = arith.constant 0.000000e+00 : f32
    %49 = vector.broadcast %cst_31 : f32 to vector<2x4xf32>
    %50 = arith.maximumf %48, %49 : vector<2x4xf32>
    %51 = vector.extract_strided_slice %2 {offsets = [0, 42], sizes = [2, 15], strides = [1, 1]} : vector<2x112xf32> to vector<2x15xf32>
    %cst_32 = arith.constant dense<0.000000e+00> : vector<2x4xf32>
    %52 = tpu.matmul %51, %4, %cst_32 {dimension_numbers = #tpu.dot_dimension_numbers<[1], [0], [0], [1], [0, 0, 1, 1], [], []>} : vector<2x15xf32>, vector<15x4xf32>, vector<2x4xf32> -> vector<2x4xf32>
    %53 = vector.broadcast %6 : vector<1x4xf32> to vector<2x4xf32>
    %54 = arith.addf %52, %53 : vector<2x4xf32>
    %cst_33 = arith.constant 0.000000e+00 : f32
    %55 = vector.broadcast %cst_33 : f32 to vector<2x4xf32>
    %56 = arith.maximumf %54, %55 : vector<2x4xf32>
    %57 = vector.extract_strided_slice %2 {offsets = [0, 49], sizes = [2, 15], strides = [1, 1]} : vector<2x112xf32> to vector<2x15xf32>
    %cst_34 = arith.constant dense<0.000000e+00> : vector<2x4xf32>
    %58 = tpu.matmul %57, %4, %cst_34 {dimension_numbers = #tpu.dot_dimension_numbers<[1], [0], [0], [1], [0, 0, 1, 1], [], []>} : vector<2x15xf32>, vector<15x4xf32>, vector<2x4xf32> -> vector<2x4xf32>
    %59 = vector.broadcast %6 : vector<1x4xf32> to vector<2x4xf32>
    %60 = arith.addf %58, %59 : vector<2x4xf32>
    %cst_35 = arith.constant 0.000000e+00 : f32
    %61 = vector.broadcast %cst_35 : f32 to vector<2x4xf32>
    %62 = arith.maximumf %60, %61 : vector<2x4xf32>
    %63 = vector.extract_strided_slice %2 {offsets = [0, 56], sizes = [2, 15], strides = [1, 1]} : vector<2x112xf32> to vector<2x15xf32>
    %cst_36 = arith.constant dense<0.000000e+00> : vector<2x4xf32>
    %64 = tpu.matmul %63, %4, %cst_36 {dimension_numbers = #tpu.dot_dimension_numbers<[1], [0], [0], [1], [0, 0, 1, 1], [], []>} : vector<2x15xf32>, vector<15x4xf32>, vector<2x4xf32> -> vector<2x4xf32>
    %65 = vector.broadcast %6 : vector<1x4xf32> to vector<2x4xf32>
    %66 = arith.addf %64, %65 : vector<2x4xf32>
    %cst_37 = arith.constant 0.000000e+00 : f32
    %67 = vector.broadcast %cst_37 : f32 to vector<2x4xf32>
    %68 = arith.maximumf %66, %67 : vector<2x4xf32>
    %69 = vector.extract_strided_slice %2 {offsets = [0, 63], sizes = [2, 15], strides = [1, 1]} : vector<2x112xf32> to vector<2x15xf32>
    %cst_38 = arith.constant dense<0.000000e+00> : vector<2x4xf32>
    %70 = tpu.matmul %69, %4, %cst_38 {dimension_numbers = #tpu.dot_dimension_numbers<[1], [0], [0], [1], [0, 0, 1, 1], [], []>} : vector<2x15xf32>, vector<15x4xf32>, vector<2x4xf32> -> vector<2x4xf32>
    %71 = vector.broadcast %6 : vector<1x4xf32> to vector<2x4xf32>
    %72 = arith.addf %70, %71 : vector<2x4xf32>
    %cst_39 = arith.constant 0.000000e+00 : f32
    %73 = vector.broadcast %cst_39 : f32 to vector<2x4xf32>
    %74 = arith.maximumf %72, %73 : vector<2x4xf32>
    %75 = vector.extract_strided_slice %2 {offsets = [0, 70], sizes = [2, 15], strides = [1, 1]} : vector<2x112xf32> to vector<2x15xf32>
    %cst_40 = arith.constant dense<0.000000e+00> : vector<2x4xf32>
    %76 = tpu.matmul %75, %4, %cst_40 {dimension_numbers = #tpu.dot_dimension_numbers<[1], [0], [0], [1], [0, 0, 1, 1], [], []>} : vector<2x15xf32>, vector<15x4xf32>, vector<2x4xf32> -> vector<2x4xf32>
    %77 = vector.broadcast %6 : vector<1x4xf32> to vector<2x4xf32>
    %78 = arith.addf %76, %77 : vector<2x4xf32>
    %cst_41 = arith.constant 0.000000e+00 : f32
    %79 = vector.broadcast %cst_41 : f32 to vector<2x4xf32>
    %80 = arith.maximumf %78, %79 : vector<2x4xf32>
    %81 = vector.extract_strided_slice %2 {offsets = [0, 77], sizes = [2, 15], strides = [1, 1]} : vector<2x112xf32> to vector<2x15xf32>
    %cst_42 = arith.constant dense<0.000000e+00> : vector<2x4xf32>
    %82 = tpu.matmul %81, %4, %cst_42 {dimension_numbers = #tpu.dot_dimension_numbers<[1], [0], [0], [1], [0, 0, 1, 1], [], []>} : vector<2x15xf32>, vector<15x4xf32>, vector<2x4xf32> -> vector<2x4xf32>
    %83 = vector.broadcast %6 : vector<1x4xf32> to vector<2x4xf32>
    %84 = arith.addf %82, %83 : vector<2x4xf32>
    %cst_43 = arith.constant 0.000000e+00 : f32
    %85 = vector.broadcast %cst_43 : f32 to vector<2x4xf32>
    %86 = arith.maximumf %84, %85 : vector<2x4xf32>
    %87 = vector.extract_strided_slice %2 {offsets = [0, 84], sizes = [2, 15], strides = [1, 1]} : vector<2x112xf32> to vector<2x15xf32>
    %cst_44 = arith.constant dense<0.000000e+00> : vector<2x4xf32>
    %88 = tpu.matmul %87, %4, %cst_44 {dimension_numbers = #tpu.dot_dimension_numbers<[1], [0], [0], [1], [0, 0, 1, 1], [], []>} : vector<2x15xf32>, vector<15x4xf32>, vector<2x4xf32> -> vector<2x4xf32>
    %89 = vector.broadcast %6 : vector<1x4xf32> to vector<2x4xf32>
    %90 = arith.addf %88, %89 : vector<2x4xf32>
    %cst_45 = arith.constant 0.000000e+00 : f32
    %91 = vector.broadcast %cst_45 : f32 to vector<2x4xf32>
    %92 = arith.maximumf %90, %91 : vector<2x4xf32>
    %93 = vector.extract_strided_slice %2 {offsets = [0, 91], sizes = [2, 15], strides = [1, 1]} : vector<2x112xf32> to vector<2x15xf32>
    %cst_46 = arith.constant dense<0.000000e+00> : vector<2x4xf32>
    %94 = tpu.matmul %93, %4, %cst_46 {dimension_numbers = #tpu.dot_dimension_numbers<[1], [0], [0], [1], [0, 0, 1, 1], [], []>} : vector<2x15xf32>, vector<15x4xf32>, vector<2x4xf32> -> vector<2x4xf32>
    %95 = vector.broadcast %6 : vector<1x4xf32> to vector<2x4xf32>
    %96 = arith.addf %94, %95 : vector<2x4xf32>
    %cst_47 = arith.constant 0.000000e+00 : f32
    %97 = vector.broadcast %cst_47 : f32 to vector<2x4xf32>
    %98 = arith.maximumf %96, %97 : vector<2x4xf32>
    %99 = tpu.concatenate %0, %0, %0, %0, %0, %0, %0, %20, %26, %32, %38, %44, %50, %56, %62 in 1 : vector<2x4xf32>, vector<2x4xf32>, vector<2x4xf32>, vector<2x4xf32>, vector<2x4xf32>, vector<2x4xf32>, vector<2x4xf32>, vector<2x4xf32>, vector<2x4xf32>, vector<2x4xf32>, vector<2x4xf32>, vector<2x4xf32>, vector<2x4xf32>, vector<2x4xf32>, vector<2x4xf32> -> vector<2x60xf32>
    %cst_48 = arith.constant dense<0.000000e+00> : vector<2x8xf32>
    %100 = tpu.matmul %99, %8, %cst_48 {dimension_numbers = #tpu.dot_dimension_numbers<[1], [0], [0], [1], [0, 0, 1, 1], [], []>} : vector<2x60xf32>, vector<60x8xf32>, vector<2x8xf32> -> vector<2x8xf32>
    %101 = vector.broadcast %10 : vector<1x8xf32> to vector<2x8xf32>
    %102 = arith.addf %100, %101 : vector<2x8xf32>
    %cst_49 = arith.constant 0.000000e+00 : f32
    %103 = vector.broadcast %cst_49 : f32 to vector<2x8xf32>
    %104 = arith.maximumf %102, %103 : vector<2x8xf32>
    %cst_50 = arith.constant dense<0.000000e+00> : vector<2x16xf32>
    %105 = tpu.matmul %104, %12, %cst_50 {dimension_numbers = #tpu.dot_dimension_numbers<[1], [0], [0], [1], [0, 0, 1, 1], [], []>} : vector<2x8xf32>, vector<8x16xf32>, vector<2x16xf32> -> vector<2x16xf32>
    %106 = vector.broadcast %14 : vector<1x16xf32> to vector<2x16xf32>
    %107 = arith.addf %105, %106 : vector<2x16xf32>
    %cst_51 = arith.constant 0.000000e+00 : f32
    %108 = vector.broadcast %cst_51 : f32 to vector<2x16xf32>
    %109 = arith.maximumf %107, %108 : vector<2x16xf32>
    %110 = tpu.concatenate %20, %26, %32, %38, %44, %50, %56, %62, %68, %74, %80, %86, %92, %98, %0 in 1 : vector<2x4xf32>, vector<2x4xf32>, vector<2x4xf32>, vector<2x4xf32>, vector<2x4xf32>, vector<2x4xf32>, vector<2x4xf32>, vector<2x4xf32>, vector<2x4xf32>, vector<2x4xf32>, vector<2x4xf32>, vector<2x4xf32>, vector<2x4xf32>, vector<2x4xf32>, vector<2x4xf32> -> vector<2x60xf32>
    %cst_52 = arith.constant dense<0.000000e+00> : vector<2x8xf32>
    %111 = tpu.matmul %110, %8, %cst_52 {dimension_numbers = #tpu.dot_dimension_numbers<[1], [0], [0], [1], [0, 0, 1, 1], [], []>} : vector<2x60xf32>, vector<60x8xf32>, vector<2x8xf32> -> vector<2x8xf32>
    %112 = vector.broadcast %10 : vector<1x8xf32> to vector<2x8xf32>
    %113 = arith.addf %111, %112 : vector<2x8xf32>
    %cst_53 = arith.constant 0.000000e+00 : f32
    %114 = vector.broadcast %cst_53 : f32 to vector<2x8xf32>
    %115 = arith.maximumf %113, %114 : vector<2x8xf32>
    %cst_54 = arith.constant dense<0.000000e+00> : vector<2x16xf32>
    %116 = tpu.matmul %115, %12, %cst_54 {dimension_numbers = #tpu.dot_dimension_numbers<[1], [0], [0], [1], [0, 0, 1, 1], [], []>} : vector<2x8xf32>, vector<8x16xf32>, vector<2x16xf32> -> vector<2x16xf32>
    %117 = vector.broadcast %14 : vector<1x16xf32> to vector<2x16xf32>
    %118 = arith.addf %116, %117 : vector<2x16xf32>
    %cst_55 = arith.constant 0.000000e+00 : f32
    %119 = vector.broadcast %cst_55 : f32 to vector<2x16xf32>
    %120 = arith.maximumf %118, %119 : vector<2x16xf32>
    %121 = tpu.concatenate %109, %120 in 1 : vector<2x16xf32>, vector<2x16xf32> -> vector<2x32xf32>
    %c1 = arith.constant 1 : index
    %c0_56 = arith.constant 0 : index
    %c0_57 = arith.constant 0 : index
    %122 = vector.load %arg1[%c1, %c0_56, %c0_57] : memref<2x2x112xf32, #tpu.memory_space<vmem>>, vector<1x2x112xf32>
    %123 = vector.shape_cast %122 : vector<1x2x112xf32> to vector<2x112xf32>
    %c1_58 = arith.constant 1 : index
    %c0_59 = arith.constant 0 : index
    %c0_60 = arith.constant 0 : index
    %124 = vector.load %arg2[%c1_58, %c0_59, %c0_60] : memref<2x15x4xf32, #tpu.memory_space<vmem>>, vector<1x15x4xf32>
    %125 = vector.shape_cast %124 : vector<1x15x4xf32> to vector<15x4xf32>
    %c1_61 = arith.constant 1 : index
    %c0_62 = arith.constant 0 : index
    %c0_63 = arith.constant 0 : index
    %126 = vector.load %arg3[%c1_61, %c0_62, %c0_63] : memref<2x1x4xf32, #tpu.memory_space<vmem>>, vector<1x1x4xf32>
    %127 = vector.shape_cast %126 : vector<1x1x4xf32> to vector<1x4xf32>
    %c1_64 = arith.constant 1 : index
    %c0_65 = arith.constant 0 : index
    %c0_66 = arith.constant 0 : index
    %128 = vector.load %arg4[%c1_64, %c0_65, %c0_66] : memref<2x60x8xf32, #tpu.memory_space<vmem>>, vector<1x60x8xf32>
    %129 = vector.shape_cast %128 : vector<1x60x8xf32> to vector<60x8xf32>
    %c1_67 = arith.constant 1 : index
    %c0_68 = arith.constant 0 : index
    %c0_69 = arith.constant 0 : index
    %130 = vector.load %arg5[%c1_67, %c0_68, %c0_69] : memref<2x1x8xf32, #tpu.memory_space<vmem>>, vector<1x1x8xf32>
    %131 = vector.shape_cast %130 : vector<1x1x8xf32> to vector<1x8xf32>
    %c1_70 = arith.constant 1 : index
    %c0_71 = arith.constant 0 : index
    %c0_72 = arith.constant 0 : index
    %132 = vector.load %arg6[%c1_70, %c0_71, %c0_72] : memref<2x8x16xf32, #tpu.memory_space<vmem>>, vector<1x8x16xf32>
    %133 = vector.shape_cast %132 : vector<1x8x16xf32> to vector<8x16xf32>
    %c1_73 = arith.constant 1 : index
    %c0_74 = arith.constant 0 : index
    %c0_75 = arith.constant 0 : index
    %134 = vector.load %arg7[%c1_73, %c0_74, %c0_75] : memref<2x1x16xf32, #tpu.memory_space<vmem>>, vector<1x1x16xf32>
    %135 = vector.shape_cast %134 : vector<1x1x16xf32> to vector<1x16xf32>
    %136 = vector.extract_strided_slice %123 {offsets = [0, 0], sizes = [2, 15], strides = [1, 1]} : vector<2x112xf32> to vector<2x15xf32>
    %cst_76 = arith.constant dense<0.000000e+00> : vector<2x4xf32>
    %137 = tpu.matmul %136, %125, %cst_76 {dimension_numbers = #tpu.dot_dimension_numbers<[1], [0], [0], [1], [0, 0, 1, 1], [], []>} : vector<2x15xf32>, vector<15x4xf32>, vector<2x4xf32> -> vector<2x4xf32>
    %138 = vector.broadcast %127 : vector<1x4xf32> to vector<2x4xf32>
    %139 = arith.addf %137, %138 : vector<2x4xf32>
    %cst_77 = arith.constant 0.000000e+00 : f32
    %140 = vector.broadcast %cst_77 : f32 to vector<2x4xf32>
    %141 = arith.maximumf %139, %140 : vector<2x4xf32>
    %142 = vector.extract_strided_slice %123 {offsets = [0, 7], sizes = [2, 15], strides = [1, 1]} : vector<2x112xf32> to vector<2x15xf32>
    %cst_78 = arith.constant dense<0.000000e+00> : vector<2x4xf32>
    %143 = tpu.matmul %142, %125, %cst_78 {dimension_numbers = #tpu.dot_dimension_numbers<[1], [0], [0], [1], [0, 0, 1, 1], [], []>} : vector<2x15xf32>, vector<15x4xf32>, vector<2x4xf32> -> vector<2x4xf32>
    %144 = vector.broadcast %127 : vector<1x4xf32> to vector<2x4xf32>
    %145 = arith.addf %143, %144 : vector<2x4xf32>
    %cst_79 = arith.constant 0.000000e+00 : f32
    %146 = vector.broadcast %cst_79 : f32 to vector<2x4xf32>
    %147 = arith.maximumf %145, %146 : vector<2x4xf32>
    %148 = vector.extract_strided_slice %123 {offsets = [0, 14], sizes = [2, 15], strides = [1, 1]} : vector<2x112xf32> to vector<2x15xf32>
    %cst_80 = arith.constant dense<0.000000e+00> : vector<2x4xf32>
    %149 = tpu.matmul %148, %125, %cst_80 {dimension_numbers = #tpu.dot_dimension_numbers<[1], [0], [0], [1], [0, 0, 1, 1], [], []>} : vector<2x15xf32>, vector<15x4xf32>, vector<2x4xf32> -> vector<2x4xf32>
    %150 = vector.broadcast %127 : vector<1x4xf32> to vector<2x4xf32>
    %151 = arith.addf %149, %150 : vector<2x4xf32>
    %cst_81 = arith.constant 0.000000e+00 : f32
    %152 = vector.broadcast %cst_81 : f32 to vector<2x4xf32>
    %153 = arith.maximumf %151, %152 : vector<2x4xf32>
    %154 = vector.extract_strided_slice %123 {offsets = [0, 21], sizes = [2, 15], strides = [1, 1]} : vector<2x112xf32> to vector<2x15xf32>
    %cst_82 = arith.constant dense<0.000000e+00> : vector<2x4xf32>
    %155 = tpu.matmul %154, %125, %cst_82 {dimension_numbers = #tpu.dot_dimension_numbers<[1], [0], [0], [1], [0, 0, 1, 1], [], []>} : vector<2x15xf32>, vector<15x4xf32>, vector<2x4xf32> -> vector<2x4xf32>
    %156 = vector.broadcast %127 : vector<1x4xf32> to vector<2x4xf32>
    %157 = arith.addf %155, %156 : vector<2x4xf32>
    %cst_83 = arith.constant 0.000000e+00 : f32
    %158 = vector.broadcast %cst_83 : f32 to vector<2x4xf32>
    %159 = arith.maximumf %157, %158 : vector<2x4xf32>
    %160 = vector.extract_strided_slice %123 {offsets = [0, 28], sizes = [2, 15], strides = [1, 1]} : vector<2x112xf32> to vector<2x15xf32>
    %cst_84 = arith.constant dense<0.000000e+00> : vector<2x4xf32>
    %161 = tpu.matmul %160, %125, %cst_84 {dimension_numbers = #tpu.dot_dimension_numbers<[1], [0], [0], [1], [0, 0, 1, 1], [], []>} : vector<2x15xf32>, vector<15x4xf32>, vector<2x4xf32> -> vector<2x4xf32>
    %162 = vector.broadcast %127 : vector<1x4xf32> to vector<2x4xf32>
    %163 = arith.addf %161, %162 : vector<2x4xf32>
    %cst_85 = arith.constant 0.000000e+00 : f32
    %164 = vector.broadcast %cst_85 : f32 to vector<2x4xf32>
    %165 = arith.maximumf %163, %164 : vector<2x4xf32>
    %166 = vector.extract_strided_slice %123 {offsets = [0, 35], sizes = [2, 15], strides = [1, 1]} : vector<2x112xf32> to vector<2x15xf32>
    %cst_86 = arith.constant dense<0.000000e+00> : vector<2x4xf32>
    %167 = tpu.matmul %166, %125, %cst_86 {dimension_numbers = #tpu.dot_dimension_numbers<[1], [0], [0], [1], [0, 0, 1, 1], [], []>} : vector<2x15xf32>, vector<15x4xf32>, vector<2x4xf32> -> vector<2x4xf32>
    %168 = vector.broadcast %127 : vector<1x4xf32> to vector<2x4xf32>
    %169 = arith.addf %167, %168 : vector<2x4xf32>
    %cst_87 = arith.constant 0.000000e+00 : f32
    %170 = vector.broadcast %cst_87 : f32 to vector<2x4xf32>
    %171 = arith.maximumf %169, %170 : vector<2x4xf32>
    %172 = vector.extract_strided_slice %123 {offsets = [0, 42], sizes = [2, 15], strides = [1, 1]} : vector<2x112xf32> to vector<2x15xf32>
    %cst_88 = arith.constant dense<0.000000e+00> : vector<2x4xf32>
    %173 = tpu.matmul %172, %125, %cst_88 {dimension_numbers = #tpu.dot_dimension_numbers<[1], [0], [0], [1], [0, 0, 1, 1], [], []>} : vector<2x15xf32>, vector<15x4xf32>, vector<2x4xf32> -> vector<2x4xf32>
    %174 = vector.broadcast %127 : vector<1x4xf32> to vector<2x4xf32>
    %175 = arith.addf %173, %174 : vector<2x4xf32>
    %cst_89 = arith.constant 0.000000e+00 : f32
    %176 = vector.broadcast %cst_89 : f32 to vector<2x4xf32>
    %177 = arith.maximumf %175, %176 : vector<2x4xf32>
    %178 = vector.extract_strided_slice %123 {offsets = [0, 49], sizes = [2, 15], strides = [1, 1]} : vector<2x112xf32> to vector<2x15xf32>
    %cst_90 = arith.constant dense<0.000000e+00> : vector<2x4xf32>
    %179 = tpu.matmul %178, %125, %cst_90 {dimension_numbers = #tpu.dot_dimension_numbers<[1], [0], [0], [1], [0, 0, 1, 1], [], []>} : vector<2x15xf32>, vector<15x4xf32>, vector<2x4xf32> -> vector<2x4xf32>
    %180 = vector.broadcast %127 : vector<1x4xf32> to vector<2x4xf32>
    %181 = arith.addf %179, %180 : vector<2x4xf32>
    %cst_91 = arith.constant 0.000000e+00 : f32
    %182 = vector.broadcast %cst_91 : f32 to vector<2x4xf32>
    %183 = arith.maximumf %181, %182 : vector<2x4xf32>
    %184 = vector.extract_strided_slice %123 {offsets = [0, 56], sizes = [2, 15], strides = [1, 1]} : vector<2x112xf32> to vector<2x15xf32>
    %cst_92 = arith.constant dense<0.000000e+00> : vector<2x4xf32>
    %185 = tpu.matmul %184, %125, %cst_92 {dimension_numbers = #tpu.dot_dimension_numbers<[1], [0], [0], [1], [0, 0, 1, 1], [], []>} : vector<2x15xf32>, vector<15x4xf32>, vector<2x4xf32> -> vector<2x4xf32>
    %186 = vector.broadcast %127 : vector<1x4xf32> to vector<2x4xf32>
    %187 = arith.addf %185, %186 : vector<2x4xf32>
    %cst_93 = arith.constant 0.000000e+00 : f32
    %188 = vector.broadcast %cst_93 : f32 to vector<2x4xf32>
    %189 = arith.maximumf %187, %188 : vector<2x4xf32>
    %190 = vector.extract_strided_slice %123 {offsets = [0, 63], sizes = [2, 15], strides = [1, 1]} : vector<2x112xf32> to vector<2x15xf32>
    %cst_94 = arith.constant dense<0.000000e+00> : vector<2x4xf32>
    %191 = tpu.matmul %190, %125, %cst_94 {dimension_numbers = #tpu.dot_dimension_numbers<[1], [0], [0], [1], [0, 0, 1, 1], [], []>} : vector<2x15xf32>, vector<15x4xf32>, vector<2x4xf32> -> vector<2x4xf32>
    %192 = vector.broadcast %127 : vector<1x4xf32> to vector<2x4xf32>
    %193 = arith.addf %191, %192 : vector<2x4xf32>
    %cst_95 = arith.constant 0.000000e+00 : f32
    %194 = vector.broadcast %cst_95 : f32 to vector<2x4xf32>
    %195 = arith.maximumf %193, %194 : vector<2x4xf32>
    %196 = vector.extract_strided_slice %123 {offsets = [0, 70], sizes = [2, 15], strides = [1, 1]} : vector<2x112xf32> to vector<2x15xf32>
    %cst_96 = arith.constant dense<0.000000e+00> : vector<2x4xf32>
    %197 = tpu.matmul %196, %125, %cst_96 {dimension_numbers = #tpu.dot_dimension_numbers<[1], [0], [0], [1], [0, 0, 1, 1], [], []>} : vector<2x15xf32>, vector<15x4xf32>, vector<2x4xf32> -> vector<2x4xf32>
    %198 = vector.broadcast %127 : vector<1x4xf32> to vector<2x4xf32>
    %199 = arith.addf %197, %198 : vector<2x4xf32>
    %cst_97 = arith.constant 0.000000e+00 : f32
    %200 = vector.broadcast %cst_97 : f32 to vector<2x4xf32>
    %201 = arith.maximumf %199, %200 : vector<2x4xf32>
    %202 = vector.extract_strided_slice %123 {offsets = [0, 77], sizes = [2, 15], strides = [1, 1]} : vector<2x112xf32> to vector<2x15xf32>
    %cst_98 = arith.constant dense<0.000000e+00> : vector<2x4xf32>
    %203 = tpu.matmul %202, %125, %cst_98 {dimension_numbers = #tpu.dot_dimension_numbers<[1], [0], [0], [1], [0, 0, 1, 1], [], []>} : vector<2x15xf32>, vector<15x4xf32>, vector<2x4xf32> -> vector<2x4xf32>
    %204 = vector.broadcast %127 : vector<1x4xf32> to vector<2x4xf32>
    %205 = arith.addf %203, %204 : vector<2x4xf32>
    %cst_99 = arith.constant 0.000000e+00 : f32
    %206 = vector.broadcast %cst_99 : f32 to vector<2x4xf32>
    %207 = arith.maximumf %205, %206 : vector<2x4xf32>
    %208 = vector.extract_strided_slice %123 {offsets = [0, 84], sizes = [2, 15], strides = [1, 1]} : vector<2x112xf32> to vector<2x15xf32>
    %cst_100 = arith.constant dense<0.000000e+00> : vector<2x4xf32>
    %209 = tpu.matmul %208, %125, %cst_100 {dimension_numbers = #tpu.dot_dimension_numbers<[1], [0], [0], [1], [0, 0, 1, 1], [], []>} : vector<2x15xf32>, vector<15x4xf32>, vector<2x4xf32> -> vector<2x4xf32>
    %210 = vector.broadcast %127 : vector<1x4xf32> to vector<2x4xf32>
    %211 = arith.addf %209, %210 : vector<2x4xf32>
    %cst_101 = arith.constant 0.000000e+00 : f32
    %212 = vector.broadcast %cst_101 : f32 to vector<2x4xf32>
    %213 = arith.maximumf %211, %212 : vector<2x4xf32>
    %214 = vector.extract_strided_slice %123 {offsets = [0, 91], sizes = [2, 15], strides = [1, 1]} : vector<2x112xf32> to vector<2x15xf32>
    %cst_102 = arith.constant dense<0.000000e+00> : vector<2x4xf32>
    %215 = tpu.matmul %214, %125, %cst_102 {dimension_numbers = #tpu.dot_dimension_numbers<[1], [0], [0], [1], [0, 0, 1, 1], [], []>} : vector<2x15xf32>, vector<15x4xf32>, vector<2x4xf32> -> vector<2x4xf32>
    %216 = vector.broadcast %127 : vector<1x4xf32> to vector<2x4xf32>
    %217 = arith.addf %215, %216 : vector<2x4xf32>
    %cst_103 = arith.constant 0.000000e+00 : f32
    %218 = vector.broadcast %cst_103 : f32 to vector<2x4xf32>
    %219 = arith.maximumf %217, %218 : vector<2x4xf32>
    %220 = tpu.concatenate %0, %0, %0, %0, %0, %0, %0, %141, %147, %153, %159, %165, %171, %177, %183 in 1 : vector<2x4xf32>, vector<2x4xf32>, vector<2x4xf32>, vector<2x4xf32>, vector<2x4xf32>, vector<2x4xf32>, vector<2x4xf32>, vector<2x4xf32>, vector<2x4xf32>, vector<2x4xf32>, vector<2x4xf32>, vector<2x4xf32>, vector<2x4xf32>, vector<2x4xf32>, vector<2x4xf32> -> vector<2x60xf32>
    %cst_104 = arith.constant dense<0.000000e+00> : vector<2x8xf32>
    %221 = tpu.matmul %220, %129, %cst_104 {dimension_numbers = #tpu.dot_dimension_numbers<[1], [0], [0], [1], [0, 0, 1, 1], [], []>} : vector<2x60xf32>, vector<60x8xf32>, vector<2x8xf32> -> vector<2x8xf32>
    %222 = vector.broadcast %131 : vector<1x8xf32> to vector<2x8xf32>
    %223 = arith.addf %221, %222 : vector<2x8xf32>
    %cst_105 = arith.constant 0.000000e+00 : f32
    %224 = vector.broadcast %cst_105 : f32 to vector<2x8xf32>
    %225 = arith.maximumf %223, %224 : vector<2x8xf32>
    %cst_106 = arith.constant dense<0.000000e+00> : vector<2x16xf32>
    %226 = tpu.matmul %225, %133, %cst_106 {dimension_numbers = #tpu.dot_dimension_numbers<[1], [0], [0], [1], [0, 0, 1, 1], [], []>} : vector<2x8xf32>, vector<8x16xf32>, vector<2x16xf32> -> vector<2x16xf32>
    %227 = vector.broadcast %135 : vector<1x16xf32> to vector<2x16xf32>
    %228 = arith.addf %226, %227 : vector<2x16xf32>
    %cst_107 = arith.constant 0.000000e+00 : f32
    %229 = vector.broadcast %cst_107 : f32 to vector<2x16xf32>
    %230 = arith.maximumf %228, %229 : vector<2x16xf32>
    %231 = tpu.concatenate %141, %147, %153, %159, %165, %171, %177, %183, %189, %195, %201, %207, %213, %219, %0 in 1 : vector<2x4xf32>, vector<2x4xf32>, vector<2x4xf32>, vector<2x4xf32>, vector<2x4xf32>, vector<2x4xf32>, vector<2x4xf32>, vector<2x4xf32>, vector<2x4xf32>, vector<2x4xf32>, vector<2x4xf32>, vector<2x4xf32>, vector<2x4xf32>, vector<2x4xf32>, vector<2x4xf32> -> vector<2x60xf32>
    %cst_108 = arith.constant dense<0.000000e+00> : vector<2x8xf32>
    %232 = tpu.matmul %231, %129, %cst_108 {dimension_numbers = #tpu.dot_dimension_numbers<[1], [0], [0], [1], [0, 0, 1, 1], [], []>} : vector<2x60xf32>, vector<60x8xf32>, vector<2x8xf32> -> vector<2x8xf32>
    %233 = vector.broadcast %131 : vector<1x8xf32> to vector<2x8xf32>
    %234 = arith.addf %232, %233 : vector<2x8xf32>
    %cst_109 = arith.constant 0.000000e+00 : f32
    %235 = vector.broadcast %cst_109 : f32 to vector<2x8xf32>
    %236 = arith.maximumf %234, %235 : vector<2x8xf32>
    %cst_110 = arith.constant dense<0.000000e+00> : vector<2x16xf32>
    %237 = tpu.matmul %236, %133, %cst_110 {dimension_numbers = #tpu.dot_dimension_numbers<[1], [0], [0], [1], [0, 0, 1, 1], [], []>} : vector<2x8xf32>, vector<8x16xf32>, vector<2x16xf32> -> vector<2x16xf32>
    %238 = vector.broadcast %135 : vector<1x16xf32> to vector<2x16xf32>
    %239 = arith.addf %237, %238 : vector<2x16xf32>
    %cst_111 = arith.constant 0.000000e+00 : f32
    %240 = vector.broadcast %cst_111 : f32 to vector<2x16xf32>
    %241 = arith.maximumf %239, %240 : vector<2x16xf32>
    %242 = tpu.concatenate %230, %241 in 1 : vector<2x16xf32>, vector<2x16xf32> -> vector<2x32xf32>
    %243 = tpu.concatenate %121, %242 in 1 : vector<2x32xf32>, vector<2x32xf32> -> vector<2x64xf32>
    %c0_112 = arith.constant 0 : index
    %c0_113 = arith.constant 0 : index
    %244 = vector.load %arg8[%c0_112, %c0_113] : memref<64x32xf32, #tpu.memory_space<vmem>>, vector<64x32xf32>
    %cst_114 = arith.constant dense<0.000000e+00> : vector<2x32xf32>
    %245 = tpu.matmul %243, %244, %cst_114 {dimension_numbers = #tpu.dot_dimension_numbers<[1], [0], [0], [1], [0, 0, 1, 1], [], []>} : vector<2x64xf32>, vector<64x32xf32>, vector<2x32xf32> -> vector<2x32xf32>
    %c0_115 = arith.constant 0 : index
    %c0_116 = arith.constant 0 : index
    %246 = vector.load %arg9[%c0_115, %c0_116] : memref<1x32xf32, #tpu.memory_space<vmem>>, vector<1x32xf32>
    %247 = vector.broadcast %246 : vector<1x32xf32> to vector<2x32xf32>
    %248 = arith.addf %245, %247 : vector<2x32xf32>
    %cst_117 = arith.constant 0.000000e+00 : f32
    %249 = vector.broadcast %cst_117 : f32 to vector<2x32xf32>
    %250 = arith.maximumf %248, %249 : vector<2x32xf32>
    %c0_118 = arith.constant 0 : index
    %c0_119 = arith.constant 0 : index
    %251 = vector.load %arg10[%c0_118, %c0_119] : memref<32x16xf32, #tpu.memory_space<vmem>>, vector<32x16xf32>
    %cst_120 = arith.constant dense<0.000000e+00> : vector<2x16xf32>
    %252 = tpu.matmul %250, %251, %cst_120 {dimension_numbers = #tpu.dot_dimension_numbers<[1], [0], [0], [1], [0, 0, 1, 1], [], []>} : vector<2x32xf32>, vector<32x16xf32>, vector<2x16xf32> -> vector<2x16xf32>
    %c0_121 = arith.constant 0 : index
    %c0_122 = arith.constant 0 : index
    %253 = vector.load %arg11[%c0_121, %c0_122] : memref<1x16xf32, #tpu.memory_space<vmem>>, vector<1x16xf32>
    %254 = vector.broadcast %253 : vector<1x16xf32> to vector<2x16xf32>
    %255 = arith.addf %252, %254 : vector<2x16xf32>
    %cst_123 = arith.constant 0.000000e+00 : f32
    %256 = vector.broadcast %cst_123 : f32 to vector<2x16xf32>
    %257 = arith.maximumf %255, %256 : vector<2x16xf32>
    %c0_124 = arith.constant 0 : index
    %c0_125 = arith.constant 0 : index
    %258 = vector.load %arg12[%c0_124, %c0_125] : memref<16x4xf32, #tpu.memory_space<vmem>>, vector<16x4xf32>
    %cst_126 = arith.constant dense<0.000000e+00> : vector<2x4xf32>
    %259 = tpu.matmul %257, %258, %cst_126 {dimension_numbers = #tpu.dot_dimension_numbers<[1], [0], [0], [1], [0, 0, 1, 1], [], []>} : vector<2x16xf32>, vector<16x4xf32>, vector<2x4xf32> -> vector<2x4xf32>
    %c0_127 = arith.constant 0 : index
    %c0_128 = arith.constant 0 : index
    %260 = vector.load %arg13[%c0_127, %c0_128] : memref<1x4xf32, #tpu.memory_space<vmem>>, vector<1x4xf32>
    %261 = vector.broadcast %260 : vector<1x4xf32> to vector<2x4xf32>
    %262 = arith.addf %259, %261 : vector<2x4xf32>
    %c0_129 = arith.constant 0 : index
    %c0_130 = arith.constant 0 : index
    %263 = vector.load %arg14[%c0_129, %c0_130] : memref<2x4xf32, #tpu.memory_space<vmem>>, vector<2x4xf32>
    tpu.vector_store %arg14[%c0_129, %c0_130], %262 {strides = array<i32>} : memref<2x4xf32, #tpu.memory_space<vmem>>, vector<2x4xf32>,
    return
  }
  func.func @transform_0(%arg0: i32) -> (i32, i32, i32) {
    %c0_i32 = arith.constant 0 : i32
    %c0_i32_0 = arith.constant 0 : i32
    %c0_i32_1 = arith.constant 0 : i32
    %c0_i32_2 = arith.constant 0 : i32
    return %c0_i32, %c0_i32_0, %c0_i32_1 : i32, i32, i32
  }
  func.func @transform_1(%arg0: i32) -> (i32, i32, i32) {
    %c0_i32 = arith.constant 0 : i32
    %c0_i32_0 = arith.constant 0 : i32
    %c0_i32_1 = arith.constant 0 : i32
    %c0_i32_2 = arith.constant 0 : i32
    return %c0_i32, %c0_i32_0, %c0_i32_1 : i32, i32, i32
  }
  func.func @transform_2(%arg0: i32) -> (i32, i32, i32) {
    %c0_i32 = arith.constant 0 : i32
    %c0_i32_0 = arith.constant 0 : i32
    %c0_i32_1 = arith.constant 0 : i32
    %c0_i32_2 = arith.constant 0 : i32
    return %c0_i32, %c0_i32_0, %c0_i32_1 : i32, i32, i32
  }
  func.func @transform_3(%arg0: i32) -> (i32, i32, i32) {
    %c0_i32 = arith.constant 0 : i32
    %c0_i32_0 = arith.constant 0 : i32
    %c0_i32_1 = arith.constant 0 : i32
    %c0_i32_2 = arith.constant 0 : i32
    return %c0_i32, %c0_i32_0, %c0_i32_1 : i32, i32, i32
  }
  func.func @transform_4(%arg0: i32) -> (i32, i32, i32) {
    %c0_i32 = arith.constant 0 : i32
    %c0_i32_0 = arith.constant 0 : i32
    %c0_i32_1 = arith.constant 0 : i32
    %c0_i32_2 = arith.constant 0 : i32
    return %c0_i32, %c0_i32_0, %c0_i32_1 : i32, i32, i32
  }
  func.func @transform_5(%arg0: i32) -> (i32, i32, i32) {
    %c0_i32 = arith.constant 0 : i32
    %c0_i32_0 = arith.constant 0 : i32
    %c0_i32_1 = arith.constant 0 : i32
    %c0_i32_2 = arith.constant 0 : i32
    return %c0_i32, %c0_i32_0, %c0_i32_1 : i32, i32, i32
  }
  func.func @transform_6(%arg0: i32) -> (i32, i32, i32) {
    %c0_i32 = arith.constant 0 : i32
    %c0_i32_0 = arith.constant 0 : i32
    %c0_i32_1 = arith.constant 0 : i32
    %c0_i32_2 = arith.constant 0 : i32
    return %c0_i32, %c0_i32_0, %c0_i32_1 : i32, i32, i32
  }
  func.func @transform_7(%arg0: i32) -> (i32, i32) {
    %c0_i32 = arith.constant 0 : i32
    %c0_i32_0 = arith.constant 0 : i32
    %c0_i32_1 = arith.constant 0 : i32
    return %c0_i32, %c0_i32_0 : i32, i32
  }
  func.func @transform_8(%arg0: i32) -> (i32, i32) {
    %c0_i32 = arith.constant 0 : i32
    %c0_i32_0 = arith.constant 0 : i32
    %c0_i32_1 = arith.constant 0 : i32
    return %c0_i32, %c0_i32_0 : i32, i32
  }
  func.func @transform_9(%arg0: i32) -> (i32, i32) {
    %c0_i32 = arith.constant 0 : i32
    %c0_i32_0 = arith.constant 0 : i32
    %c0_i32_1 = arith.constant 0 : i32
    return %c0_i32, %c0_i32_0 : i32, i32
  }
  func.func @transform_10(%arg0: i32) -> (i32, i32) {
    %c0_i32 = arith.constant 0 : i32
    %c0_i32_0 = arith.constant 0 : i32
    %c0_i32_1 = arith.constant 0 : i32
    return %c0_i32, %c0_i32_0 : i32, i32
  }
  func.func @transform_11(%arg0: i32) -> (i32, i32) {
    %c0_i32 = arith.constant 0 : i32
    %c0_i32_0 = arith.constant 0 : i32
    %c0_i32_1 = arith.constant 0 : i32
    return %c0_i32, %c0_i32_0 : i32, i32
  }
  func.func @transform_12(%arg0: i32) -> (i32, i32) {
    %c0_i32 = arith.constant 0 : i32
    %c0_i32_0 = arith.constant 0 : i32
    %c0_i32_1 = arith.constant 0 : i32
    return %c0_i32, %c0_i32_0 : i32, i32
  }
  func.func @transform_13(%arg0: i32) -> (i32, i32) {
    %c0_i32 = arith.constant 0 : i32
    %c0_i32_0 = arith.constant 0 : i32
    %c0_i32_1 = arith.constant 0 : i32
    return %c0_i32, %c0_i32_0 : i32, i32
  }
}

</mosaic_0001>

<bundles_post_ra>
// kernel: mscnn_forward.1
= control target key start
LH: loop header
LB: loop body
LE: loop exit
PB: predicated region body
PF: predicated region fallthrough
CT: control target
= control target key end

     0   :  { %s4133_s29 = smov 121   ;;  %s4134_s30 = smov 107   ;;  %vm70_vm0 = vcmask 1046528   ;;  %v4135_v3 = vmov 0.0|0.0   ;;  %vm4136_vm1 = vmmov 1   ;;  %vm4137_vm3 = vmmov 0   ;;  %s4927_s0 = inlined_call_operand.vmem [shape: f32[2,2,112], index: 0, kind: input, shape index: {}]   ;;  %s4928_s1 = inlined_call_operand.vmem [shape: f32[2,15,4], index: 1, kind: input, shape index: {}]   ;;  %s4929_s2 = inlined_call_operand.vmem [shape: f32[2,1,4], index: 2, kind: input, shape index: {}]   ;;  %s4930_s3 = inlined_call_operand.vmem [shape: f32[2,60,8], index: 3, kind: input, shape index: {}]   ;;  %s4931_s4 = inlined_call_operand.vmem [shape: f32[2,1,8], index: 4, kind: input, shape index: {}]   ;;  %s4932_s5 = inlined_call_operand.vmem [shape: f32[2,8,16], index: 5, kind: input, shape index: {}]   ;;  %s4933_s6 = inlined_call_operand.vmem [shape: f32[2,1,16], index: 6, kind: input, shape index: {}]   ;;  %s4934_s7 = inlined_call_operand.vmem [shape: f32[64,32], index: 7, kind: input, shape index: {}]   ;;  %s4935_s8 = inlined_call_operand.vmem [shape: f32[1,32], index: 8, kind: input, shape index: {}]   ;;  %s4936_s9 = inlined_call_operand.vmem [shape: f32[32,16], index: 9, kind: input, shape index: {}]   ;;  %s4937_s10 = inlined_call_operand.vmem [shape: f32[1,16], index: 10, kind: input, shape index: {}]   ;;  %s4938_s11 = inlined_call_operand.vmem [shape: f32[16,4], index: 11, kind: input, shape index: {}]   ;;  %s4939_s12 = inlined_call_operand.vmem [shape: f32[1,4], index: 12, kind: input, shape index: {}]   ;;  %s4940_s13 = inlined_call_operand.hbm [shape: f32[2,4], index: 13, kind: output, shape index: {}]  }
   0x1   :  { %v45_v0 = vld [vmem:[%s4927_s0] sm:$0x3]  ;;  %v47_v2 = vld [vmem:[%s4928_s1 + $0x8] sm:$0x7f]  ;;  %3893 = vmatprep.subr.bf16.mxu0 %v4135_v3  ;;  %vm4249_vm2 = vmpackc.low %vm70_vm0, %vm4136_vm1  ;;  %3897 = vmatprep.subr.bf16.mxu1 %v4135_v3  ;;  %v4138_v6 = vmov 0.0  }
   0x2   :  { %v46_v1 = vld [vmem:[%s4928_s1] sm:$0xff]  ;;  %145 = vrot.lane.b32.xlu0 %v45_v0, %s4133_s29  ;;  %295 = vrot.lane.b32.xlu1 %v45_v0, %s4134_s30 }
   0x3   :  { %v4246_v4 = vpack.c.bf16 %v47_v2, %v46_v1  ;;  %3568 = vmatprep.mubr.msk.f32.mxu0 %vm4137_vm3, %v4138_v6  ;;  %3575 = vmatprep.mubr.msk.f32.mxu1 %vm4137_vm3, %v4138_v6 }
   0x4   :  { %18 = vsyncpa [#allocation3], 0  ;;  %vm4955_vm4 = vcmask 121856   ;;  %s4139_s16 = smov 114   ;;  %s4140_s17 = smov 100   ;;  %v49_v25 = vld [vmem:[%s4930_s3] sm:$0xff] }
   0x5   :  { %3896 = vmatpush3.bf16.msk.msra.mxu0 %vm4249_vm2, %v4246_v4  ;;  %3900 = vmatpush3.bf16.msk.msra.mxu1 %vm4249_vm2, %v4246_v4  ;;  %s4141_s18 = smov 93   ;;  %s4948_s19 = smov 86   ;;  %v4370_v20 = vld [vmem:[%s4929_s2] ss:$0 sm:$0xff]  ;;  %v50_v26 = vld [vmem:[%s4930_s3 + $0x8] sm:$0xff]  ;;  %v51_v28 = vld [vmem:[%s4930_s3 + $0x10] sm:$0xff] }
   0x6   :  { %220 = vrot.lane.b32.xlu0 %v45_v0, %s4139_s16  ;;  %370 = vrot.lane.b32.xlu1 %v45_v0, %s4140_s17  ;;  %s4946_s20 = smov 79   ;;  %s4945_s21 = smov 72   ;;  %v4385_v27 = vpack.c.bf16 %v50_v26, %v49_v25  ;;  %v52_v29 = vld [vmem:[%s4930_s3 + $0x18] sm:$0xff]  ;;  %v53_v31 = vld [vmem:[%s4930_s3 + $0x20] sm:$0xff]  ;;  %vm1178_vm5 = vcmask 1043456   ;;  %vm1152_vm7 = vcmask 228352  }
   0x7   :  { %3901 = vmatprep.subr.bf16.mxu0 %v4135_v3  ;;  %3905 = vmatprep.subr.bf16.mxu1 %v4135_v3  ;;  %s4944_s22 = smov 65   ;;  %s4943_s23 = smov 58   ;;  %v4395_v30 = vpack.c.bf16 %v52_v29, %v51_v28  ;;  %v54_v32 = vld [vmem:[%s4930_s3 + $0x28] sm:$0xff]  ;;  %v55_v35 = vld [vmem:[%s4930_s3 + $0x30] sm:$0xff]  ;;  %v56_v36 = vld [vmem:[%s4930_s3 + $0x38] sm:$0xf] }
   0x8   :  { %3569 = vmatmul.mubr.msk.f32.vlgmr.msra.gmra.mrb[0].mxu0 %vm4955_vm4, %v45_v0  ;;  %s4942_s24 = smov 51   ;;  %s4148_s25 = smov 44   ;;  %v4405_v33 = vpack.c.bf16 %v54_v32, %v53_v31  ;;  %v4416_v39 = vpack.c.bf16 %v56_v36, %v55_v35  ;;  %vm4419_vm6 = vmpackc.low %vm1178_vm5, %vm4136_vm1  ;;  %vm1154_vm8 = vcmask 261120   ;;  %vm1156_vm9 = vcmask 293888   ;;  %v3051_v40 = vld [vmem:[%s4934_s7] sm:$0xff] }
   0x9   :  { %3904 = vmatpush3.bf16.msk.msra.mxu0 %vm4249_vm2, %v4246_v4  ;;  %3582 = vmatprep.mubr.msk.f32.mxu0 %vm4137_vm3, %v4138_v6  ;;  %s4941_s26 = smov 37   ;;  %s4150_s14 = smov 28   ;;  %vm1158_vm10 = vcmask 326656   ;;  %vm1160_vm11 = vcmask 359424   ;;  %vm1162_vm12 = vcmask 392192   ;;  %vm1164_vm13 = vcmask 424960  }
   0xa   :  { %445 = vrot.lane.b32.xlu0 %v45_v0, %s4141_s18  ;;  %520 = vrot.lane.b32.xlu1 %v45_v0, %s4948_s19  ;;  %s4153_s15 = smov 36   ;;  %s4154_s27 = smov 48   ;;  %vm1166_vm14 = vcmask 457728   ;;  %vm4956_vm15 = vcmask 490496   ;;  %vm4957_vm0 = vcmask 31744   ;;  %vm1259_vm1 = vcmask 64512  }
   0xb   :  { %3909 = vmatprep.subr.bf16.mxu0 %v4135_v3  ;;  %s4952_s28 = smov 4   ;;  %s4161_s19 = smov 24   ;;  %vm1382_vm5 = vcmask 97280  }
   0xe   :  { %595 = vrot.lane.b32.xlu0 %v45_v0, %s4946_s20  ;;  %670 = vrot.lane.b32.xlu1 %v45_v0, %s4945_s21  ;;  %s4947_s21 = smov 56   ;;  %s4159_s20 = smov 16  }
  0x12   :  { %745 = vrot.lane.b32.xlu0 %v45_v0, %s4944_s22  ;;  %820 = vrot.lane.b32.xlu1 %v45_v0, %s4943_s23  ;;  %s4953_s22 = smov 52   ;;  %s4949_s23 = smov 8  }
  0x16   :  { %895 = vrot.lane.b32.xlu0 %v45_v0, %s4942_s24  ;;  %970 = vrot.lane.b32.xlu1 %v45_v0, %s4148_s25  ;;  %s4151_s24 = smov 32  }
  0x1a   :  { %1045 = vrot.lane.b32.xlu0 %v45_v0, %s4941_s26  ;;  %s4152_s26 = smov 40  }
  0x74   :  { %v146_v7 = vpop.permute.xlu0 %145  ;;  %v296_v8 = vpop.permute.xlu1 %295 }
  0x75   :  { %3576 = vmatmul.mubr.msk.f32.vlgmr.msra.gmra.mrb[0].mxu1 %vm4955_vm4, %v146_v7 }
  0x76   :  { %3908 = vmatpush3.bf16.msk.msra.mxu1 %vm4249_vm2, %v4246_v4  ;;  %3589 = vmatprep.mubr.msk.f32.mxu1 %vm4137_vm3, %v4138_v6 }
  0x77   :  { %3913 = vmatprep.subr.bf16.mxu1 %v4135_v3 }
  0x78   :  { %v221_v9 = vpop.permute.xlu0 %220  ;;  %v371_v10 = vpop.permute.xlu1 %370 }
  0x79   :  { %3583 = vmatmul.mubr.msk.f32.vlgmr.msra.gmra.mrb[2].mxu0 %vm4955_vm4, %v221_v9  ;;  %3590 = vmatmul.mubr.msk.f32.vlgmr.msra.gmra.mrb[2].mxu1 %vm4955_vm4, %v296_v8 }
  0x7a   :  { %3912 = vmatpush3.bf16.msk.msra.mxu0 %vm4249_vm2, %v4246_v4  ;;  %3916 = vmatpush3.bf16.msk.msra.mxu1 %vm4249_vm2, %v4246_v4 }
  0x7b   :  { %3603 = vmatprep.mubr.msk.f32.mxu1 %vm4137_vm3, %v4138_v6  ;;  %3596 = vmatprep.mubr.msk.f32.mxu0 %vm4137_vm3, %v4138_v6 }
  0x7c   :  { %v446_v11 = vpop.permute.xlu0 %445  ;;  %3917 = vmatprep.subr.bf16.mxu0 %v4135_v3  ;;  %3921 = vmatprep.subr.bf16.mxu1 %v4135_v3  ;;  %v521_v12 = vpop.permute.xlu1 %520 }
  0x7d   :  { %3597 = vmatmul.mubr.msk.f32.vlgmr.msra.gmra.mrb[4].mxu0 %vm4955_vm4, %v371_v10  ;;  %3604 = vmatmul.mubr.msk.f32.vlgmr.msra.gmra.mrb[4].mxu1 %vm4955_vm4, %v446_v11 }
  0x7e   :  { %3920 = vmatpush3.bf16.msk.msra.mxu0 %vm4249_vm2, %v4246_v4  ;;  %3924 = vmatpush3.bf16.msk.msra.mxu1 %vm4249_vm2, %v4246_v4 }
  0x7f   :  { %3617 = vmatprep.mubr.msk.f32.mxu1 %vm4137_vm3, %v4138_v6  ;;  %3610 = vmatprep.mubr.msk.f32.mxu0 %vm4137_vm3, %v4138_v6 }
  0x80   :  { %v596_v13 = vpop.permute.xlu0 %595  ;;  %3925 = vmatprep.subr.bf16.mxu0 %v4135_v3  ;;  %v671_v14 = vpop.permute.xlu1 %670  ;;  %3929 = vmatprep.subr.bf16.mxu1 %v4135_v3 }
  0x81   :  { %3611 = vmatmul.mubr.msk.f32.vlgmr.msra.gmra.mrb[6].mxu0 %vm4955_vm4, %v521_v12  ;;  %3618 = vmatmul.mubr.msk.f32.vlgmr.msra.gmra.mrb[6].mxu1 %vm4955_vm4, %v596_v13 }
  0x82   :  { %3928 = vmatpush3.bf16.msk.msra.mxu0 %vm4249_vm2, %v4246_v4  ;;  %3624 = vmatprep.mubr.msk.f32.mxu0 %vm4137_vm3, %v4138_v6 }
  0x83   :  { %3932 = vmatpush3.bf16.msk.msra.mxu1 %vm4249_vm2, %v4246_v4  ;;  %3933 = vmatprep.subr.bf16.mxu0 %v4135_v3 }
  0x84   :  { %3631 = vmatprep.mubr.msk.f32.mxu1 %vm4137_vm3, %v4138_v6  ;;  %v746_v15 = vpop.permute.xlu0 %745  ;;  %v821_v16 = vpop.permute.xlu1 %820  ;;  %3937 = vmatprep.subr.bf16.mxu1 %v4135_v3 }
  0x85   :  { %3625 = vmatmul.mubr.msk.f32.vlgmr.msra.gmra.mrb[8].mxu0 %vm4955_vm4, %v671_v14 }
  0x86   :  { %3936 = vmatpush3.bf16.msk.msra.mxu0 %vm4249_vm2, %v4246_v4  ;;  %3632 = vmatmul.mubr.msk.f32.vlgmr.msra.gmra.mrb[8].mxu1 %vm4955_vm4, %v746_v15 }
  0x87   :  { %3638 = vmatprep.mubr.msk.f32.mxu0 %vm4137_vm3, %v4138_v6  ;;  %3940 = vmatpush3.bf16.msk.msra.mxu1 %vm4249_vm2, %v4246_v4 }
  0x88   :  { %3941 = vmatprep.subr.bf16.mxu0 %v4135_v3  ;;  %3645 = vmatprep.mubr.msk.f32.mxu1 %vm4137_vm3, %v4138_v6  ;;  %v896_v17 = vpop.permute.xlu0 %895  ;;  %v971_v18 = vpop.permute.xlu1 %970 }
  0x89   :  { %3639 = vmatmul.mubr.msk.f32.vlgmr.msra.gmra.mrb[10].mxu0 %vm4955_vm4, %v821_v16  ;;  %3945 = vmatprep.subr.bf16.mxu1 %v4135_v3 }
  0x8a   :  { %3944 = vmatpush3.bf16.msk.msra.mxu0 %vm4249_vm2, %v4246_v4  ;;  %3646 = vmatmul.mubr.msk.f32.vlgmr.msra.gmra.mrb[10].mxu1 %vm4955_vm4, %v896_v17 }
  0x8b   :  { %3652 = vmatprep.mubr.msk.f32.mxu0 %vm4137_vm3, %v4138_v6  ;;  %3948 = vmatpush3.bf16.msk.msra.mxu1 %vm4249_vm2, %v4246_v4 }
  0x8c   :  { %3659 = vmatprep.mubr.msk.f32.mxu1 %vm4137_vm3, %v4138_v6  ;;  %v1046_v19 = vpop.permute.xlu0 %1045  ;;  %3949 = vmatprep.subr.bf16.mxu0 %v4135_v3 }
  0x8d   :  { %3653 = vmatmul.mubr.msk.f32.vlgmr.msra.gmra.mrb[12].mxu0 %vm4955_vm4, %v971_v18  ;;  %3681 = vmatprep.subr.mxu1 %v4138_v6 }
  0x8e   :  { %3660 = vmatmul.mubr.msk.f32.vlgmr.msra.gmra.mrb[12].mxu1 %vm4955_vm4, %v1046_v19  ;;  %3678 = vmatprep.mubr.msk.f32.mxu0 %vm4137_vm3, %v4138_v6  ;;  %vm1384_vm4 = vcmask 130048  }
  0x8f   :  { %3683 = vmatprep.mubr.msk.f32.mxu1 %vm4137_vm3, %v4138_v6  ;;  %3951 = vmatpush3.bf16.msra.mxu0 %v4385_v27 }
  0x90   :  { %3952 = vmatprep.subr.bf16.mxu0 %v4135_v3 }
  0x93   :  { %3954 = vmatpush3.bf16.msra.mxu0 %v4395_v30 }
  0x94   :  { %3955 = vmatprep.subr.bf16.mxu0 %v4135_v3 }
  0x97   :  { %3957 = vmatpush3.bf16.msra.mxu0 %v4405_v33 }
  0x98   :  { %3958 = vmatprep.subr.bf16.mxu0 %v4135_v3 }
  0x9b   :  { %3961 = vmatpush3.bf16.msk.msra.mxu0 %vm4419_vm6, %v4416_v39 }
  0x9c   :  { %3705 = vmatprep.subr.mxu0 %v4138_v6 }
  0xdb   :  { %v140_v21 = vpop.f32.mrb[0].mxu0 }
  0xdc   :  { %v4373_v22 = vadd.f32 %v4370_v20, %v140_v21  ;;  %v3570_v23 = vpop.f32.mrb[1].mxu0 }
  0xde   :  { %v144_v24 = vmax.f32 %v4373_v22, 0.0 }
  0xe0   :  { %1121 = vrot.lane.b32.xlu1 %v144_v24, %s4150_s14 }
 0x148   :  { %v215_v34 = vpop.f32.mrb[0].mxu1 }
 0x149   :  { %v216_v37 = vadd.f32 %v4370_v20, %v215_v34  ;;  %v3577_v38 = vpop.f32.mrb[1].mxu1 }
 0x14b   :  { %v219_v41 = vmax.f32 %v216_v37, 0.0 }
 0x14c   :  { %v365_v42 = vpop.f32.mrb[2].mxu1  ;;  %v290_v43 = vpop.f32.mrb[2].mxu0 }
 0x14d   :  { %v366_v44 = vadd.f32 %v4370_v20, %v365_v42  ;;  %v291_v45 = vadd.f32 %v4370_v20, %v290_v43  ;;  %1125 = vrot.lane.b32.xlu0 %v219_v41, %s4151_s24  ;;  %v3584_v46 = vpop.f32.mrb[3].mxu0  ;;  %v3591_v47 = vpop.f32.mrb[3].mxu1 }
 0x14f   :  { %v369_v48 = vmax.f32 %v366_v44, 0.0  ;;  %v294_v49 = vmax.f32 %v291_v45, 0.0 }
 0x150   :  { %v440_v50 = vpop.f32.mrb[4].mxu0  ;;  %v515_v51 = vpop.f32.mrb[4].mxu1 }
 0x151   :  { %v441_v52 = vadd.f32 %v4370_v20, %v440_v50  ;;  %v516_v53 = vadd.f32 %v4370_v20, %v515_v51  ;;  %1133 = vrot.lane.b32.xlu0 %v369_v48, %s4152_s26  ;;  %v3605_v54 = vpop.f32.mrb[5].mxu1  ;;  %1129 = vrot.lane.b32.xlu1 %v294_v49, %s4153_s15  ;;  %v3598_v55 = vpop.f32.mrb[5].mxu0 }
 0x152   :  { %v1122_v35 = vpop.permute.xlu1 %1121 }
 0x153   :  { %v444_v56 = vmax.f32 %v441_v52, 0.0  ;;  %v519_v57 = vmax.f32 %v516_v53, 0.0  ;;  %v1153_v37 = vsel %vm1152_vm7, 0.0, %v1122_v35  ;;  %v58_v52 = vld [vmem:[%s4932_s5] sm:$0xff] }
 0x154   :  { %v590_v58 = vpop.f32.mrb[6].mxu0  ;;  %v665_v59 = vpop.f32.mrb[6].mxu1  ;;  %3682 = vmatpush3.msra.mxu1 %v58_v52  ;;  %v4478_v53 = vld [vmem:[%s4927_s0 + $0x2] sm:$0x3]  ;;  %s4965_s0 = smov 79  }
 0x155   :  { %v591_v60 = vadd.f32 %v4370_v20, %v590_v58  ;;  %v666_v61 = vadd.f32 %v4370_v20, %v665_v59  ;;  %1141 = vrot.lane.b32.xlu0 %v519_v57, %s4154_s27  ;;  %v3619_v62 = vpop.f32.mrb[7].mxu1  ;;  %1137 = vrot.lane.b32.xlu1 %v444_v56, %s4148_s25  ;;  %v3612_v63 = vpop.f32.mrb[7].mxu0 }
 0x156   :  { %3962 = vmatprep.subr.bf16.mxu1 %v4135_v3 }
 0x157   :  { %v594_v0 = vmax.f32 %v591_v60, 0.0  ;;  %v669_v1 = vmax.f32 %v666_v61, 0.0 }
 0x158   :  { %v740_v2 = vpop.f32.mrb[8].mxu0 }
 0x159   :  { %1149 = vrot.lane.b32.xlu0 %v669_v1, %s4947_s21  ;;  %1145 = vrot.lane.b32.xlu1 %v594_v0, %s4953_s22  ;;  %v3626_v4 = vpop.f32.mrb[9].mxu0  ;;  %v815_v7 = vpop.f32.mrb[8].mxu1  ;;  %s4951_s21 = smov 12   ;;  %v741_v14 = vadd.f32 %v4370_v20, %v740_v2 }
 0x15a   :  { %v3633_v8 = vpop.f32.mrb[9].mxu1  ;;  %v816_v19 = vadd.f32 %v4370_v20, %v815_v7 }
 0x15b   :  { %v744_v18 = vmax.f32 %v741_v14, 0.0 }
 0x15c   :  { %v890_v9 = vpop.f32.mrb[10].mxu0  ;;  %v819_v23 = vmax.f32 %v816_v19, 0.0 }
 0x15d   :  { %1337 = vrot.lane.b32.xlu0 %v294_v49, %s4949_s23  ;;  %1334 = vrot.lane.b32.xlu1 %v219_v41, %s4952_s28  ;;  %v3640_v10 = vpop.f32.mrb[11].mxu0  ;;  %v965_v11 = vpop.f32.mrb[10].mxu1  ;;  %s4950_s23 = smov 20   ;;  %v891_v21 = vadd.f32 %v4370_v20, %v890_v9  ;;  %s4983_s28 = smov 4  }
 0x15e   :  { %v3647_v12 = vpop.f32.mrb[11].mxu1  ;;  %v966_v26 = vadd.f32 %v4370_v20, %v965_v11 }
 0x15f   :  { %v894_v25 = vmax.f32 %v891_v21, 0.0 }
 0x160   :  { %v1040_v13 = vpop.f32.mrb[12].mxu0  ;;  %v969_v29 = vmax.f32 %v966_v26, 0.0 }
 0x161   :  { %1343 = vrot.lane.b32.xlu0 %v444_v56, %s4159_s20  ;;  %1340 = vrot.lane.b32.xlu1 %v369_v48, %s4951_s21  ;;  %v1115_v15 = vpop.f32.mrb[12].mxu1  ;;  %v3654_v16 = vpop.f32.mrb[13].mxu0  ;;  %v1041_v28 = vadd.f32 %v4370_v20, %v1040_v13  ;;  %s4964_s21 = smov 86  }
 0x162   :  { %v3661_v17 = vpop.f32.mrb[13].mxu1  ;;  %v1116_v32 = vadd.f32 %v4370_v20, %v1115_v15 }
 0x163   :  { %v1044_v31 = vmax.f32 %v1041_v28, 0.0 }
 0x164   :  { %v1119_v34 = vmax.f32 %v1116_v32, 0.0 }
 0x165   :  { %1349 = vrot.lane.b32.xlu0 %v594_v0, %s4161_s19  ;;  %1346 = vrot.lane.b32.xlu1 %v519_v57, %s4950_s23  ;;  %v4514_v0 = vld [vmem:[%s4931_s4] ss:$0 sm:$0xff]  ;;  %s4982_s23 = smov 52  }
 0x169   :  { %1352 = vrot.lane.b32.xlu1 %v669_v1, %s4150_s14  ;;  %1356 = vrot.lane.b32.xlu0 %v744_v18, %s4151_s24 }
 0x16d   :  { %1360 = vrot.lane.b32.xlu1 %v819_v23, %s4153_s15  ;;  %1364 = vrot.lane.b32.xlu0 %v894_v25, %s4152_s26  ;;  %v3363_v23 = vld [vmem:[%s4928_s1 + $0x18] sm:$0x7f] }
 0x171   :  { %1368 = vrot.lane.b32.xlu1 %v969_v29, %s4148_s25  ;;  %1372 = vrot.lane.b32.xlu0 %v1044_v31, %s4154_s27 }
 0x175   :  { %1376 = vrot.lane.b32.xlu1 %v1119_v34, %s4953_s22  ;;  %1656 = vrot.lane.b32.xlu0 %v4478_v53, %s4133_s29  ;;  %s4966_s22 = smov 72   ;;  %s4967_s29 = smov 65  }
 0x179   :  { %1731 = vrot.lane.b32.xlu1 %v4478_v53, %s4139_s16  ;;  %1806 = vrot.lane.b32.xlu0 %v4478_v53, %s4134_s30  ;;  %s4968_s16 = smov 58   ;;  %s4969_s30 = smov 51  }
 0x17d   :  { %1881 = vrot.lane.b32.xlu1 %v4478_v53, %s4140_s17  ;;  %1956 = vrot.lane.b32.xlu0 %v4478_v53, %s4141_s18  ;;  %s4970_s17 = smov 37   ;;  %s4163_s18 = smov [#allocation2]  }
 0x181   :  { %2031 = vrot.lane.b32.xlu1 %v4478_v53, %s4964_s21  ;;  %2106 = vrot.lane.b32.xlu0 %v4478_v53, %s4965_s0  ;;  %s4984_s21 = smov 12  }
 0x185   :  { %2181 = vrot.lane.b32.xlu1 %v4478_v53, %s4966_s22  ;;  %2256 = vrot.lane.b32.xlu0 %v4478_v53, %s4967_s29 }
 0x189   :  { %2331 = vrot.lane.b32.xlu1 %v4478_v53, %s4968_s16  ;;  %2406 = vrot.lane.b32.xlu0 %v4478_v53, %s4969_s30 }
 0x18d   :  { %2481 = vrot.lane.b32.xlu1 %v4478_v53, %s4148_s25  ;;  %2556 = vrot.lane.b32.xlu0 %v4478_v53, %s4970_s17 }
 0x1bf   :  { %v1126_v36 = vpop.permute.xlu0 %1125 }
 0x1c0   :  { %v1155_v38 = vsel %vm1154_vm8, %v1153_v37, %v1126_v36 }
 0x1c3   :  { %v1134_v41 = vpop.permute.xlu0 %1133  ;;  %v1130_v42 = vpop.permute.xlu1 %1129 }
 0x1c4   :  { %v1157_v20 = vsel %vm1156_vm9, %v1155_v38, %v1130_v42 }
 0x1c5   :  { %v1159_v44 = vsel %vm1158_vm10, %v1157_v20, %v1134_v41 }
 0x1c7   :  { %v1142_v43 = vpop.permute.xlu0 %1141  ;;  %v1138_v45 = vpop.permute.xlu1 %1137 }
 0x1c8   :  { %v1161_v46 = vsel %vm1160_vm11, %v1159_v44, %v1138_v45 }
 0x1c9   :  { %v1163_v48 = vsel %vm1162_vm12, %v1161_v46, %v1142_v43 }
 0x1cb   :  { %v1150_v47 = vpop.permute.xlu0 %1149  ;;  %v1146_v49 = vpop.permute.xlu1 %1145 }
 0x1cc   :  { %v1165_v50 = vsel %vm1164_vm13, %v1163_v48, %v1146_v49  ;;  %v4660_v48 = vld [vmem:[%s4929_s2 + $0x1] ss:$0 sm:$0xff]  ;;  %s4980_s2 = smov 56  }
 0x1cd   :  { %v1167_v51 = vsel %vm1166_vm14, %v1165_v50, %v1150_v47 }
 0x1ce   :  { %3679 = vmatmul.mubr.msk.f32.vlgmr.msra.gmra.mrb[14].mxu0 %vm4956_vm15, %v1167_v51  ;;  %vm4959_vm15 = vcmask 162816  }
 0x1cf   :  { %3707 = vmatprep.mubr.msk.f32.mxu0 %vm4137_vm3, %v4138_v6  ;;  %3706 = vmatpush3.msra.mxu0 %v58_v52  ;;  %v1335_v54 = vpop.permute.xlu1 %1334  ;;  %v1338_v55 = vpop.permute.xlu0 %1337 }
 0x1d0   :  { %3975 = vmatprep.subr.bf16.mxu0 %v4135_v3  ;;  %v1380_v59 = vsel %vm4957_vm0, %v144_v24, %v1335_v54  ;;  %vm4958_vm0 = vcmask 195584  }
 0x1d1   :  { %v1381_v61 = vsel %vm1259_vm1, %v1380_v59, %v1338_v55 }
 0x1d3   :  { %v1341_v56 = vpop.permute.xlu1 %1340  ;;  %v1344_v57 = vpop.permute.xlu0 %1343 }
 0x1d4   :  { %v1383_v63 = vsel %vm1382_vm5, %v1381_v61, %v1341_v56 }
 0x1d5   :  { %v1385_v1 = vsel %vm1384_vm4, %v1383_v63, %v1344_v57 }
 0x1d7   :  { %v1347_v58 = vpop.permute.xlu1 %1346  ;;  %v1350_v60 = vpop.permute.xlu0 %1349 }
 0x1d8   :  { %v1387_v24 = vsel %vm4959_vm15, %v1385_v1, %v1347_v58 }
 0x1d9   :  { %v1389_v10 = vsel %vm4958_vm0, %v1387_v24, %v1350_v60  ;;  %vm4971_vm0 = vcmask 490496  }
 0x1db   :  { %v1353_v62 = vpop.permute.xlu1 %1352  ;;  %v1357_v2 = vpop.permute.xlu0 %1356 }
 0x1dc   :  { %v1390_v11 = vsel %vm1152_vm7, %v1389_v10, %v1353_v62  ;;  %v3367_v10 = vld [vmem:[%s4930_s3 + $0x50] sm:$0xff] }
 0x1dd   :  { %v1391_v13 = vsel %vm1154_vm8, %v1390_v11, %v1357_v2  ;;  %v3368_v11 = vld [vmem:[%s4930_s3 + $0x58] sm:$0xff] }
 0x1df   :  { %v1361_v8 = vpop.permute.xlu1 %1360  ;;  %v1365_v12 = vpop.permute.xlu0 %1364 }
 0x1e0   :  { %v1392_v15 = vsel %vm1156_vm9, %v1391_v13, %v1361_v8  ;;  %v3366_v8 = vld [vmem:[%s4930_s3 + $0x48] sm:$0xff] }
 0x1e1   :  { %v1393_v16 = vsel %vm1158_vm10, %v1392_v15, %v1365_v12  ;;  %v4712_v12 = vpack.c.bf16 %v3368_v11, %v3367_v10  ;;  %v3370_v15 = vld [vmem:[%s4930_s3 + $0x68] sm:$0xff] }
 0x1e3   :  { %v1369_v14 = vpop.permute.xlu1 %1368 }
 0x1e4   :  { %v1394_v17 = vsel %vm1160_vm11, %v1393_v16, %v1369_v14  ;;  %v3369_v14 = vld [vmem:[%s4930_s3 + $0x60] sm:$0xff] }
 0x1e7   :  { %v1377_v18 = vpop.permute.xlu1 %1376 }
 0x1eb   :  { %v1732_v42 = vpop.permute.xlu1 %1731 }
 0x1ef   :  { %v1882_v43 = vpop.permute.xlu1 %1881 }
 0x1f3   :  { %v2032_v44 = vpop.permute.xlu1 %2031 }
 0x1f7   :  { %v2182_v45 = vpop.permute.xlu1 %2181 }
 0x1fb   :  { %v2332_v46 = vpop.permute.xlu1 %2331 }
 0x1ff   :  { %v2482_v47 = vpop.permute.xlu1 %2481 }
 0x2a1   :  { %v1248_v22 = vpop.f32.mrb[14].mxu0 }
 0x2a2   :  { %v1249_v4 = vadd.f32 %v4514_v0, %v1248_v22  ;;  %v3680_v7 = vpop.f32.mrb[15].mxu0 }
 0x2a3   :  { %v3365_v7 = vld [vmem:[%s4930_s3 + $0x40] sm:$0xff] }
 0x2a4   :  { %v1252_v9 = vmax.f32 %v1249_v4, 0.0 }
 0x2a6   :  { %3684 = vmatmul.mubr.msk.f32.vlgmr.msra.gmra.mrb[14].mxu1 %vm1259_vm1, %v1252_v9  ;;  %v4702_v9 = vpack.c.bf16 %v3366_v8, %v3365_v7 }
 0x2a7   :  { %3964 = vmatpush3.bf16.msra.mxu1 %v4385_v27  ;;  %3702 = vmatprep.mubr.msk.f32.mxu1 %vm4137_vm3, %v4138_v6  ;;  %v1373_v27 = vpop.permute.xlu0 %1372 }
 0x2a8   :  { %3965 = vmatprep.subr.bf16.mxu1 %v4135_v3  ;;  %v1395_v19 = vsel %vm1162_vm12, %v1394_v17, %v1373_v27  ;;  %v4724_v17 = vpack.c.bf16 %v3370_v15, %v3369_v14 }
 0x2a9   :  { %v1396_v21 = vsel %vm1164_vm13, %v1395_v19, %v1377_v18  ;;  %v3371_v18 = vld [vmem:[%s4930_s3 + $0x70] sm:$0xff]  ;;  %v3372_v19 = vld [vmem:[%s4930_s3 + $0x78] sm:$0xf]  ;;  %s4981_s3 = smov 8  }
 0x2ab   :  { %3967 = vmatpush3.bf16.msra.mxu1 %v4395_v30  ;;  %v1397_v30 = vsel %vm1166_vm14, %v1396_v21, 0.0 }
 0x2ac   :  { %3968 = vmatprep.subr.bf16.mxu1 %v4135_v3 }
 0x2af   :  { %3970 = vmatpush3.bf16.msra.mxu1 %v4405_v33  ;;  %v3362_v33 = vld [vmem:[%s4928_s1 + $0x10] sm:$0xff] }
 0x2b0   :  { %3971 = vmatprep.subr.bf16.mxu1 %v4135_v3  ;;  %v4550_v25 = vpack.c.bf16 %v3363_v23, %v3362_v33  ;;  %v4737_v33 = vpack.c.bf16 %v3372_v19, %v3371_v18 }
 0x2b3   :  { %3974 = vmatpush3.bf16.msk.msra.mxu1 %vm4419_vm6, %v4416_v39  ;;  %v1657_v39 = vpop.permute.xlu0 %1656 }
 0x2b4   :  { %3979 = vmatprep.subr.bf16.mxu1 %v4135_v3 }
 0x2b6   :  { %3703 = vmatmul.mubr.msk.f32.vlgmr.msra.gmra.mrb[16].mxu1 %vm4971_vm0, %v1397_v30  ;;  %vm4972_vm0 = vcmask 121856  }
 0x2b7   :  { %3721 = vmatprep.mubr.msk.f32.mxu1 %vm4137_vm3, %v4138_v6  ;;  %3982 = vmatpush3.bf16.msk.msra.mxu1 %vm4249_vm2, %v4550_v25  ;;  %v1807_v26 = vpop.permute.xlu0 %1806  ;;  %vm4973_vm15 = vmmov %vm4972_vm0 }
 0x2b8   :  { %3987 = vmatprep.subr.bf16.mxu1 %v4135_v3 }
 0x2ba   :  { %3722 = vmatmul.mubr.msk.f32.vlgmr.msra.gmra.mrb[18].mxu1 %vm4972_vm0, %v1657_v39 }
 0x2bb   :  { %3990 = vmatpush3.bf16.msk.msra.mxu1 %vm4249_vm2, %v4550_v25  ;;  %3735 = vmatprep.mubr.msk.f32.mxu1 %vm4137_vm3, %v4138_v6  ;;  %v1957_v28 = vpop.permute.xlu0 %1956 }
 0x2bc   :  { %3995 = vmatprep.subr.bf16.mxu1 %v4135_v3 }
 0x2be   :  { %3736 = vmatmul.mubr.msk.f32.vlgmr.msra.gmra.mrb[20].mxu1 %vm4973_vm15, %v1807_v26  ;;  %vm4974_vm15 = vmmov %vm4972_vm0 }
 0x2bf   :  { %3998 = vmatpush3.bf16.msk.msra.mxu1 %vm4249_vm2, %v4550_v25  ;;  %3749 = vmatprep.mubr.msk.f32.mxu1 %vm4137_vm3, %v4138_v6  ;;  %v2107_v29 = vpop.permute.xlu0 %2106 }
 0x2c0   :  { %4003 = vmatprep.subr.bf16.mxu1 %v4135_v3 }
 0x2c2   :  { %3750 = vmatmul.mubr.msk.f32.vlgmr.msra.gmra.mrb[22].mxu1 %vm4972_vm0, %v1957_v28 }
 0x2c3   :  { %4006 = vmatpush3.bf16.msk.msra.mxu1 %vm4249_vm2, %v4550_v25  ;;  %3763 = vmatprep.mubr.msk.f32.mxu1 %vm4137_vm3, %v4138_v6  ;;  %v2257_v31 = vpop.permute.xlu0 %2256 }
 0x2c4   :  { %4011 = vmatprep.subr.bf16.mxu1 %v4135_v3 }
 0x2c6   :  { %3764 = vmatmul.mubr.msk.f32.vlgmr.msra.gmra.mrb[24].mxu1 %vm4974_vm15, %v2107_v29  ;;  %vm4975_vm15 = vmmov %vm4972_vm0 }
 0x2c7   :  { %4014 = vmatpush3.bf16.msk.msra.mxu1 %vm4249_vm2, %v4550_v25  ;;  %3777 = vmatprep.mubr.msk.f32.mxu1 %vm4137_vm3, %v4138_v6  ;;  %v2407_v32 = vpop.permute.xlu0 %2406 }
 0x2c8   :  { %4019 = vmatprep.subr.bf16.mxu1 %v4135_v3 }
 0x2ca   :  { %3778 = vmatmul.mubr.msk.f32.vlgmr.msra.gmra.mrb[26].mxu1 %vm4972_vm0, %v2257_v31 }
 0x2cb   :  { %4022 = vmatpush3.bf16.msk.msra.mxu1 %vm4249_vm2, %v4550_v25  ;;  %3791 = vmatprep.mubr.msk.f32.mxu1 %vm4137_vm3, %v4138_v6  ;;  %v2557_v34 = vpop.permute.xlu0 %2556 }
 0x2cc   :  { %4027 = vmatprep.subr.bf16.mxu1 %v4135_v3 }
 0x2ce   :  { %3792 = vmatmul.mubr.msk.f32.vlgmr.msra.gmra.mrb[28].mxu1 %vm4975_vm15, %v2407_v32  ;;  %vm4976_vm15 = vmmov %vm4972_vm0 }
 0x2cf   :  { %4030 = vmatpush3.bf16.msk.msra.mxu1 %vm4249_vm2, %v4550_v25  ;;  %3805 = vmatprep.mubr.msk.f32.mxu1 %vm4137_vm3, %v4138_v6 }
 0x2d0   :  { %3827 = vmatprep.subr.mxu1 %v4138_v6 }
 0x2d2   :  { %3806 = vmatmul.mubr.msk.f32.vlgmr.msra.gmra.mrb[30].mxu1 %vm4972_vm0, %v2557_v34 }
 0x2d3   :  { %3829 = vmatprep.mubr.msk.f32.mxu1 %vm4137_vm3, %v4138_v6 }
 0x379   :  { %v4601_v35 = vpop.f32.mrb[14].mxu1 }
 0x37a   :  { %v3685_v36 = vpop.f32.mrb[15].mxu1 }
 0x389   :  { %v1467_v37 = vpop.f32.mrb[16].mxu1 }
 0x38a   :  { %v1468_v38 = vadd.f32 %v4514_v0, %v1467_v37  ;;  %v3704_v41 = vpop.f32.mrb[17].mxu1 }
 0x38c   :  { %v1471_v20 = vmax.f32 %v1468_v38, 0.0 }
 0x38d   :  { %v1726_v49 = vpop.f32.mrb[18].mxu1 }
 0x38e   :  { %3708 = vmatmul.mubr.msk.f32.vlgmr.msra.gmra.mrb[16].mxu0 %vm1259_vm1, %v1471_v20  ;;  %v4663_v5 = vadd.f32 %v4660_v48, %v1726_v49  ;;  %v3723_v50 = vpop.f32.mrb[19].mxu1 }
 0x38f   :  { %3978 = vmatpush3.bf16.msk.msra.mxu0 %vm4249_vm2, %v4550_v25  ;;  %3714 = vmatprep.mubr.msk.f32.mxu0 %vm4137_vm3, %v4138_v6 }
 0x390   :  { %3983 = vmatprep.subr.bf16.mxu0 %v4135_v3  ;;  %v1730_v51 = vmax.f32 %v4663_v5, 0.0 }
 0x391   :  { %v1876_v52 = vpop.f32.mrb[20].mxu1 }
 0x392   :  { %3715 = vmatmul.mubr.msk.f32.vlgmr.msra.gmra.mrb[18].mxu0 %vm4976_vm15, %v4478_v53  ;;  %vm4977_vm15 = vmmov %vm4972_vm0  ;;  %v4667_v53 = vadd.f32 %v4660_v48, %v1876_v52  ;;  %2636 = vrot.lane.b32.xlu0 %v1730_v51, %s4151_s24  ;;  %v3737_v54 = vpop.f32.mrb[21].mxu1 }
 0x393   :  { %3986 = vmatpush3.bf16.msk.msra.mxu0 %vm4249_vm2, %v4550_v25  ;;  %3728 = vmatprep.mubr.msk.f32.mxu0 %vm4137_vm3, %v4138_v6 }
 0x394   :  { %3991 = vmatprep.subr.bf16.mxu0 %v4135_v3  ;;  %v1880_v55 = vmax.f32 %v4667_v53, 0.0 }
 0x395   :  { %v2026_v56 = vpop.f32.mrb[22].mxu1 }
 0x396   :  { %3729 = vmatmul.mubr.msk.f32.vlgmr.msra.gmra.mrb[20].mxu0 %vm4972_vm0, %v1732_v42  ;;  %2644 = vrot.lane.b32.xlu0 %v1880_v55, %s4152_s26  ;;  %v4677_v57 = vadd.f32 %v4660_v48, %v2026_v56  ;;  %v3751_v58 = vpop.f32.mrb[23].mxu1 }
 0x397   :  { %3994 = vmatpush3.bf16.msk.msra.mxu0 %vm4249_vm2, %v4550_v25  ;;  %3742 = vmatprep.mubr.msk.f32.mxu0 %vm4137_vm3, %v4138_v6 }
 0x398   :  { %3999 = vmatprep.subr.bf16.mxu0 %v4135_v3  ;;  %v2030_v59 = vmax.f32 %v4677_v57, 0.0 }
 0x399   :  { %v2176_v60 = vpop.f32.mrb[24].mxu1 }
 0x39a   :  { %3743 = vmatmul.mubr.msk.f32.vlgmr.msra.gmra.mrb[22].mxu0 %vm4977_vm15, %v1882_v43  ;;  %vm4978_vm15 = vmmov %vm4972_vm0  ;;  %v4681_v61 = vadd.f32 %v4660_v48, %v2176_v60  ;;  %2652 = vrot.lane.b32.xlu0 %v2030_v59, %s4154_s27  ;;  %v3765_v62 = vpop.f32.mrb[25].mxu1 }
 0x39b   :  { %4002 = vmatpush3.bf16.msk.msra.mxu0 %vm4249_vm2, %v4550_v25  ;;  %3756 = vmatprep.mubr.msk.f32.mxu0 %vm4137_vm3, %v4138_v6 }
 0x39c   :  { %4007 = vmatprep.subr.bf16.mxu0 %v4135_v3  ;;  %v2180_v63 = vmax.f32 %v4681_v61, 0.0 }
 0x39d   :  { %v4690_v0 = vpop.f32.mrb[26].mxu1 }
 0x39e   :  { %3757 = vmatmul.mubr.msk.f32.vlgmr.msra.gmra.mrb[24].mxu0 %vm4972_vm0, %v2032_v44  ;;  %2660 = vrot.lane.b32.xlu0 %v2180_v63, %s4980_s2  ;;  %v3779_v1 = vpop.f32.mrb[27].mxu1  ;;  %v2327_v5 = vadd.f32 %v4660_v48, %v4690_v0 }
 0x39f   :  { %4010 = vmatpush3.bf16.msk.msra.mxu0 %vm4249_vm2, %v4550_v25  ;;  %3770 = vmatprep.mubr.msk.f32.mxu0 %vm4137_vm3, %v4138_v6 }
 0x3a0   :  { %4015 = vmatprep.subr.bf16.mxu0 %v4135_v3 }
 0x3a1   :  { %v4692_v22 = vpop.f32.mrb[28].mxu1 }
 0x3a2   :  { %3771 = vmatmul.mubr.msk.f32.vlgmr.msra.gmra.mrb[26].mxu0 %vm4978_vm15, %v2182_v45  ;;  %vm4979_vm15 = vmmov %vm4972_vm0  ;;  %v3793_v24 = vpop.f32.mrb[29].mxu1  ;;  %v2477_v53 = vadd.f32 %v4660_v48, %v4692_v22 }
 0x3a3   :  { %4018 = vmatpush3.bf16.msk.msra.mxu0 %vm4249_vm2, %v4550_v25  ;;  %3784 = vmatprep.mubr.msk.f32.mxu0 %vm4137_vm3, %v4138_v6 }
 0x3a4   :  { %4023 = vmatprep.subr.bf16.mxu0 %v4135_v3 }
 0x3a5   :  { %v4694_v2 = vpop.f32.mrb[30].mxu1 }
 0x3a6   :  { %3785 = vmatmul.mubr.msk.f32.vlgmr.msra.gmra.mrb[28].mxu0 %vm4972_vm0, %v2332_v46  ;;  %v3807_v4 = vpop.f32.mrb[31].mxu1  ;;  %v2627_v57 = vadd.f32 %v4660_v48, %v4694_v2  ;;  %vm4987_vm0 = vcmask 31744  }
 0x3a7   :  { %4026 = vmatpush3.bf16.msk.msra.mxu0 %vm4249_vm2, %v4550_v25  ;;  %3798 = vmatprep.mubr.msk.f32.mxu0 %vm4137_vm3, %v4138_v6  ;;  %vm4986_vm2 = vcmask 490496  }
 0x3a8   :  { %4031 = vmatprep.subr.bf16.mxu0 %v4135_v3  ;;  %v2630_v58 = vmax.f32 %v2627_v57, 0.0 }
 0x3aa   :  { %3799 = vmatmul.mubr.msk.f32.vlgmr.msra.gmra.mrb[30].mxu0 %vm4979_vm15, %v2482_v47  ;;  %vm4988_vm15 = vcmask 162816  }
 0x3ab   :  { %3824 = vmatprep.mubr.msk.f32.mxu0 %vm4137_vm3, %v4138_v6  ;;  %4033 = vmatpush3.bf16.msra.mxu0 %v4702_v9 }
 0x3ac   :  { %4034 = vmatprep.subr.bf16.mxu0 %v4135_v3 }
 0x3af   :  { %4036 = vmatpush3.bf16.msra.mxu0 %v4712_v12 }
 0x3b0   :  { %4037 = vmatprep.subr.bf16.mxu0 %v4135_v3 }
 0x3b3   :  { %4039 = vmatpush3.bf16.msra.mxu0 %v4724_v17 }
 0x3b4   :  { %4040 = vmatprep.subr.bf16.mxu0 %v4135_v3 }
 0x3b7   :  { %4043 = vmatpush3.bf16.msk.msra.mxu0 %vm4419_vm6, %v4737_v33 }
 0x3b8   :  { %3851 = vmatprep.subr.mxu0 %v4138_v6 }
 0x404   :  { %v2637_v62 = vpop.permute.xlu0 %2636 }
 0x408   :  { %v2645_v0 = vpop.permute.xlu0 %2644 }
 0x40c   :  { %v2653_v2 = vpop.permute.xlu0 %2652 }
 0x461   :  { %v4715_v13 = vpop.f32.mrb[16].mxu0 }
 0x462   :  { %v3709_v16 = vpop.f32.mrb[17].mxu0 }
 0x463   :  { %v3374_v16 = vld [vmem:[%s4932_s5 + $0x8] sm:$0xff] }
 0x464   :  { %3828 = vmatpush3.msra.mxu1 %v3374_v16 }
 0x465   :  { %v1651_v27 = vpop.f32.mrb[18].mxu0  ;;  %4044 = vmatprep.subr.bf16.mxu1 %v4135_v3 }
 0x466   :  { %v4735_v21 = vadd.f32 %v4660_v48, %v1651_v27  ;;  %v3716_v30 = vpop.f32.mrb[19].mxu0 }
 0x468   :  { %v1655_v23 = vmax.f32 %v4735_v21, 0.0 }
 0x469   :  { %v1801_v25 = vpop.f32.mrb[20].mxu0 }
 0x46a   :  { %v1802_v39 = vadd.f32 %v4660_v48, %v1801_v25  ;;  %2632 = vrot.lane.b32.xlu1 %v1655_v23, %s4150_s14  ;;  %v3730_v26 = vpop.f32.mrb[21].mxu0 }
 0x46c   :  { %v1805_v28 = vmax.f32 %v1802_v39, 0.0 }
 0x46d   :  { %v1951_v29 = vpop.f32.mrb[22].mxu0 }
 0x46e   :  { %v1952_v31 = vadd.f32 %v4660_v48, %v1951_v29  ;;  %2837 = vrot.lane.b32.xlu0 %v1805_v28, %s4981_s3  ;;  %2640 = vrot.lane.b32.xlu1 %v1805_v28, %s4153_s15  ;;  %v3744_v32 = vpop.f32.mrb[23].mxu0  ;;  %s3316_s3 = sshll.u32 %s4163_s18, 4  ;;  %s3317_s3 = int_to_ptr.vmem [resolvable:$true] %s3316_s3 }
 0x46f   :  { %v3405_v32 = vld [vmem:[%s4931_s4 + $0x1] ss:$0 sm:$0xff]  ;;  %p4114_p1 = scmp.lt.s32.totalorder %s3317_s3, %s3317_s3 }
 0x470   :  { %v1955_v34 = vmax.f32 %v1952_v31, 0.0 }
 0x471   :  { %v2101_v36 = vpop.f32.mrb[24].mxu0 }
 0x472   :  { %v2102_v37 = vadd.f32 %v4660_v48, %v2101_v36  ;;  %2843 = vrot.lane.b32.xlu0 %v1955_v34, %s4159_s20  ;;  %2648 = vrot.lane.b32.xlu1 %v1955_v34, %s4148_s25  ;;  %v3758_v38 = vpop.f32.mrb[25].mxu0 }
 0x474   :  { %v2105_v41 = vmax.f32 %v2102_v37, 0.0 }
 0x475   :  { %v2251_v42 = vpop.f32.mrb[26].mxu0 }
 0x476   :  { %2849 = vrot.lane.b32.xlu0 %v2105_v41, %s4161_s19  ;;  %2656 = vrot.lane.b32.xlu1 %v2105_v41, %s4982_s23  ;;  %v2252_v20 = vadd.f32 %v4660_v48, %v2251_v42  ;;  %v3772_v43 = vpop.f32.mrb[27].mxu0  ;;  %s4985_s19 = smov 20  }
 0x478   :  { %v2255_v44 = vmax.f32 %v2252_v20, 0.0 }
 0x479   :  { %v2401_v45 = vpop.f32.mrb[28].mxu0 }
 0x47a   :  { %2834 = vrot.lane.b32.xlu1 %v1730_v51, %s4983_s28  ;;  %v2402_v46 = vadd.f32 %v4660_v48, %v2401_v45  ;;  %2856 = vrot.lane.b32.xlu0 %v2255_v44, %s4151_s24  ;;  %v3786_v47 = vpop.f32.mrb[29].mxu0  ;;  %v2330_v51 = vmax.f32 %v2327_v5, 0.0 }
 0x47c   :  { %v2405_v49 = vmax.f32 %v2402_v46, 0.0 }
 0x47d   :  { %v2551_v50 = vpop.f32.mrb[30].mxu0 }
 0x47e   :  { %2840 = vrot.lane.b32.xlu1 %v1880_v55, %s4984_s21  ;;  %v2552_v52 = vadd.f32 %v4660_v48, %v2551_v50  ;;  %2864 = vrot.lane.b32.xlu0 %v2405_v49, %s4152_s26  ;;  %v3800_v54 = vpop.f32.mrb[31].mxu0  ;;  %v2480_v55 = vmax.f32 %v2477_v53, 0.0 }
 0x480   :  { %v2555_v56 = vmax.f32 %v2552_v52, 0.0 }
 0x482   :  { %2846 = vrot.lane.b32.xlu1 %v2030_v59, %s4985_s19  ;;  %2872 = vrot.lane.b32.xlu0 %v2555_v56, %s4154_s27  ;;  %v4785_v59 = vld [vmem:[%s4933_s6] ss:$0 sm:$0xff] }
 0x483   :  { %v1542_v60 = vadd.f32 %v4785_v59, %v4715_v13  ;;  %v2661_v13 = vpop.permute.xlu0 %2660 }
 0x485   :  { %v1545_v61 = vmax.f32 %v1542_v60, 0.0 }
 0x486   :  { %2852 = vrot.lane.b32.xlu1 %v2180_v63, %s4150_s14 }
 0x48a   :  { %2860 = vrot.lane.b32.xlu1 %v2330_v51, %s4153_s15 }
 0x48e   :  { %2868 = vrot.lane.b32.xlu1 %v2480_v55, %s4148_s25 }
 0x492   :  { %2876 = vrot.lane.b32.xlu1 %v2630_v58, %s4982_s23  ;;  %v3053_v58 = vld [vmem:[%s4934_s7 + $0x10] sm:$0xff] }
 0x496   :  { %1547 = vrot.lane.b32.xlu1 %v1545_v61, %s4159_s20  ;;  %v3054_v61 = vld [vmem:[%s4934_s7 + $0x18] sm:$0xff] }
 0x4dc   :  { %v2633_v63 = vpop.permute.xlu1 %2632 }
 0x4dd   :  { %v2663_v48 = vsel %vm1152_vm7, 0.0, %v2633_v63  ;;  %v3055_v63 = vld [vmem:[%s4934_s7 + $0x20] sm:$0xff] }
 0x4de   :  { %v2664_v1 = vsel %vm1154_vm8, %v2663_v48, %v2637_v62  ;;  %v4061_v62 = vpack.c.bf16 %v3054_v61, %v3053_v58  ;;  %v3408_v48 = vld [vmem:[%s4933_s6 + $0x1] ss:$0 sm:$0xff] }
 0x4e0   :  { %v2641_v22 = vpop.permute.xlu1 %2640  ;;  %v2838_v19 = vpop.permute.xlu0 %2837 }
 0x4e1   :  { %v2665_v24 = vsel %vm1156_vm9, %v2664_v1, %v2641_v22 }
 0x4e2   :  { %v2666_v4 = vsel %vm1158_vm10, %v2665_v24, %v2645_v0  ;;  %v3056_v0 = vld [vmem:[%s4934_s7 + $0x28] sm:$0xff] }
 0x4e3   :  { %v4064_v22 = vpack.c.bf16 %v3056_v0, %v3055_v63 }
 0x4e4   :  { %v2649_v7 = vpop.permute.xlu1 %2648  ;;  %v2844_v25 = vpop.permute.xlu0 %2843 }
 0x4e5   :  { %v2667_v8 = vsel %vm1160_vm11, %v2666_v4, %v2649_v7  ;;  %v3057_v4 = vld [vmem:[%s4934_s7 + $0x30] sm:$0xff]  ;;  %v3058_v7 = vld [vmem:[%s4934_s7 + $0x38] sm:$0xff] }
 0x4e6   :  { %v2668_v10 = vsel %vm1162_vm12, %v2667_v8, %v2653_v2 }
 0x4e8   :  { %v2657_v11 = vpop.permute.xlu1 %2656  ;;  %v2850_v29 = vpop.permute.xlu0 %2849 }
 0x4e9   :  { %v2669_v14 = vsel %vm1164_vm13, %v2668_v10, %v2657_v11  ;;  %v4067_v10 = vpack.c.bf16 %v3058_v7, %v3057_v4  ;;  %v3141_v11 = vld [vmem:[%s4936_s9] sm:$0xff] }
 0x4ea   :  { %v2670_v15 = vsel %vm1166_vm14, %v2669_v14, %v2661_v13  ;;  %v3142_v13 = vld [vmem:[%s4936_s9 + $0x8] sm:$0xff] }
 0x4eb   :  { %3825 = vmatmul.mubr.msk.f32.vlgmr.msra.gmra.mrb[32].mxu0 %vm4986_vm2, %v2670_v15  ;;  %vm4989_vm2 = vcmask 195584   ;;  %v4070_v14 = vpack.c.bf16 %v3142_v13, %v3141_v11 }
 0x4ec   :  { %3853 = vmatprep.mubr.msk.f32.mxu0 %vm4137_vm3, %v4138_v6  ;;  %3852 = vmatpush3.msra.mxu0 %v3374_v16  ;;  %v2835_v27 = vpop.permute.xlu1 %2834  ;;  %v2857_v38 = vpop.permute.xlu0 %2856 }
 0x4ed   :  { %4057 = vmatprep.subr.bf16.mxu0 %v4135_v3  ;;  %v2879_v39 = vsel %vm4987_vm0, %v1655_v23, %v2835_v27 }
 0x4ee   :  { %v2880_v26 = vsel %vm1259_vm1, %v2879_v39, %v2838_v19  ;;  %v1330_v19 = vadd.f32 %v4785_v59, %v4601_v35  ;;  %v3413_v35 = vld [vmem:[%s4935_s8] ss:$0 sm:$0xff] }
 0x4f0   :  { %v2841_v18 = vpop.permute.xlu1 %2840  ;;  %v2865_v44 = vpop.permute.xlu0 %2864 }
 0x4f1   :  { %v2881_v31 = vsel %vm1382_vm5, %v2880_v26, %v2841_v18 }
 0x4f2   :  { %v2882_v34 = vsel %vm1384_vm4, %v2881_v31, %v2844_v25  ;;  %v1333_v25 = vmax.f32 %v1330_v19, 0.0  ;;  %v3144_v31 = vld [vmem:[%s4936_s9 + $0x18] sm:$0xff] }
 0x4f4   :  { %v2847_v30 = vpop.permute.xlu1 %2846 }
 0x4f5   :  { %v2883_v37 = vsel %vm4988_vm15, %v2882_v34, %v2847_v30 }
 0x4f6   :  { %v2884_v20 = vsel %vm4989_vm2, %v2883_v37, %v2850_v29  ;;  %v3143_v29 = vld [vmem:[%s4936_s9 + $0x10] sm:$0xff] }
 0x4f8   :  { %v2853_v28 = vpop.permute.xlu1 %2852 }
 0x4f9   :  { %v2885_v43 = vsel %vm1152_vm7, %v2884_v20, %v2853_v28  ;;  %vm4990_vm7 = vcmask 490496  }
 0x4fa   :  { %v2886_v45 = vsel %vm1154_vm8, %v2885_v43, %v2857_v38  ;;  %v3226_v38 = vld [vmem:[%s4938_s11] sm:$0xff] }
 0x4fc   :  { %v2861_v42 = vpop.permute.xlu1 %2860 }
 0x4fd   :  { %v2887_v47 = vsel %vm1156_vm9, %v2886_v45, %v2861_v42 }
 0x4fe   :  { %v2888_v49 = vsel %vm1158_vm10, %v2887_v47, %v2865_v44 }
 0x500   :  { %v2869_v46 = vpop.permute.xlu1 %2868 }
 0x501   :  { %v2889_v50 = vsel %vm1160_vm11, %v2888_v49, %v2869_v46 }
 0x504   :  { %v2877_v52 = vpop.permute.xlu1 %2876 }
 0x508   :  { %v1548_v30 = vpop.permute.xlu1 %1547 }
 0x509   :  { %v1550_v39 = vsel %vm1384_vm4, %v1333_v25, %v1548_v30 }
 0x5be   :  { %v2749_v36 = vpop.f32.mrb[32].mxu0 }
 0x5bf   :  { %v2750_v41 = vadd.f32 %v3405_v32, %v2749_v36  ;;  %v3826_v21 = vpop.f32.mrb[33].mxu0 }
 0x5c0   :  { %v3415_v21 = vld [vmem:[%s4937_s10] ss:$0 sm:$0xff] }
 0x5c1   :  { %v2753_v23 = vmax.f32 %v2750_v41, 0.0 }
 0x5c3   :  { %3830 = vmatmul.mubr.msk.f32.vlgmr.msra.gmra.mrb[32].mxu1 %vm1259_vm1, %v2753_v23 }
 0x5c4   :  { %4046 = vmatpush3.bf16.msra.mxu1 %v4702_v9  ;;  %3848 = vmatprep.mubr.msk.f32.mxu1 %vm4137_vm3, %v4138_v6  ;;  %v2873_v9 = vpop.permute.xlu0 %2872 }
 0x5c5   :  { %4047 = vmatprep.subr.bf16.mxu1 %v4135_v3  ;;  %v2890_v54 = vsel %vm1162_vm12, %v2889_v50, %v2873_v9 }
 0x5c6   :  { %v2891_v56 = vsel %vm1164_vm13, %v2890_v54, %v2877_v52 }
 0x5c8   :  { %4049 = vmatpush3.bf16.msra.mxu1 %v4712_v12  ;;  %v2892_v12 = vsel %vm1166_vm14, %v2891_v56, 0.0 }
 0x5c9   :  { %4050 = vmatprep.subr.bf16.mxu1 %v4135_v3 }
 0x5cc   :  { %4052 = vmatpush3.bf16.msra.mxu1 %v4724_v17 }
 0x5cd   :  { %4053 = vmatprep.subr.bf16.mxu1 %v4135_v3 }
 0x5d0   :  { %4056 = vmatpush3.bf16.msk.msra.mxu1 %vm4419_vm6, %v4737_v33  ;;  %v3052_v33 = vld [vmem:[%s4934_s7 + $0x8] sm:$0xff]  ;;  %vm3066_vm6 = vcmask 523264  }
 0x5d1   :  { %4069 = vmatprep.subr.bf16.mxu1 %v4135_v3  ;;  %v4058_v60 = vpack.c.bf16 %v3052_v33, %v3051_v40 }
 0x5d3   :  { %3849 = vmatmul.mubr.msk.f32.vlgmr.msra.gmra.mrb[34].mxu1 %vm4990_vm7, %v2892_v12 }
 0x5d4   :  { %3883 = vmatprep.mubr.msk.f32.mxu1 %vm4137_vm3, %v4138_v6  ;;  %4071 = vmatpush3.bf16.msra.mxu1 %v4070_v14 }
 0x5d5   :  { %4072 = vmatprep.subr.bf16.mxu1 %v4135_v3 }
 0x696   :  { %v2829_v17 = vpop.f32.mrb[32].mxu1 }
 0x697   :  { %v3831_v5 = vpop.f32.mrb[33].mxu1  ;;  %v2830_v15 = vadd.f32 %v3408_v48, %v2829_v17 }
 0x699   :  { %v2833_v16 = vmax.f32 %v2830_v15, 0.0 }
 0x6a6   :  { %v2962_v51 = vpop.f32.mrb[34].mxu1 }
 0x6a7   :  { %v2963_v53 = vadd.f32 %v3405_v32, %v2962_v51  ;;  %v3850_v55 = vpop.f32.mrb[35].mxu1  ;;  %v4073_v32 = vpack.c.bf16 %v3144_v31, %v3143_v29 }
 0x6a9   :  { %v2966_v57 = vmax.f32 %v2963_v53, 0.0  ;;  %4074 = vmatpush3.bf16.msra.mxu1 %v4073_v32 }
 0x6aa   :  { %4075 = vmatprep.subr.bf16.mxu1 %v4135_v3 }
 0x6ab   :  { %3854 = vmatmul.mubr.msk.f32.vlgmr.msra.gmra.mrb[34].mxu0 %vm1259_vm1, %v2966_v57 }
 0x6ac   :  { %3872 = vmatprep.mubr.msk.f32.mxu0 %vm4137_vm3, %v4138_v6  ;;  %4059 = vmatpush3.bf16.msra.mxu0 %v4058_v60 }
 0x6ad   :  { %4060 = vmatprep.subr.bf16.mxu0 %v4135_v3 }
 0x6b0   :  { %4062 = vmatpush3.bf16.msra.mxu0 %v4061_v62 }
 0x6b1   :  { %4063 = vmatprep.subr.bf16.mxu0 %v4135_v3 }
 0x6b4   :  { %4065 = vmatpush3.bf16.msra.mxu0 %v4064_v22 }
 0x6b5   :  { %4066 = vmatprep.subr.bf16.mxu0 %v4135_v3  ;;  %v3227_v3 = vld [vmem:[%s4938_s11 + $0x8] sm:$0xff]  ;;  %s4109_s11 = scalar_lea.vmem %s3317_s3, 32 }
 0x6b6   :  { %v4076_v41 = vpack.c.bf16 %v3227_v3, %v3226_v38  ;;  %p4110_p0 = scmp.ne.s32.totalorder %s3317_s3, %s4109_s11  ;;  %p4115_p2 = scmp.lt.s32.totalorder %s4109_s11, %s4109_s11 }
 0x6b8   :  { %4068 = vmatpush3.bf16.msra.mxu0 %v4067_v10  ;;  %p4116_p3 = por %p4115_p2, %p4114_p1 }
 0x6ba   :  { %p4117_p4 = pnand %p4116_p3, %p4110_p0 }
 0x77e   :  { %v3036_v1 = vpop.f32.mrb[34].mxu0 }
 0x77f   :  { %v3037_v24 = vadd.f32 %v3408_v48, %v3036_v1  ;;  %v3855_v2 = vpop.f32.mrb[35].mxu0 }
 0x781   :  { %v3040_v8 = vmax.f32 %v3037_v24, 0.0 }
 0x783   :  { %3042 = vrot.lane.b32.xlu0 %v3040_v8, %s4159_s20 }
 0x7f5   :  { %v3043_v27 = vpop.permute.xlu0 %3042 }
 0x7f6   :  { %v3045_v18 = vsel %vm1384_vm4, %v2833_v16, %v3043_v27 }
 0x7f7   :  { %3047 = vrot.lane.b32.xlu0 %v3045_v18, %s4151_s24 }
 0x869   :  { %v3048_v26 = vpop.permute.xlu0 %3047 }
 0x86a   :  { %v3050_v28 = vsel %vm1154_vm8, %v1550_v39, %v3048_v26 }
 0x86b   :  { %3873 = vmatmul.mubr.msk.f32.vlgmr.msra.gmra.mrb[36].mxu0 %vm3066_vm6, %v3050_v28 }
 0x93e   :  { %v3136_v59 = vpop.f32.mrb[36].mxu0 }
 0x93f   :  { %v3137_v34 = vadd.f32 %v3413_v35, %v3136_v59  ;;  %v3874_v36 = vpop.f32.mrb[37].mxu0 }
 0x941   :  { %v3140_v37 = vmax.f32 %v3137_v34, 0.0 }
 0x943   :  { %3884 = vmatmul.mubr.msk.f32.vlgmr.msra.gmra.mrb[36].mxu1 %vm1154_vm8, %v3140_v37 }
 0x944   :  { %3890 = vmatprep.mubr.msk.f32.mxu1 %vm4137_vm3, %v4138_v6  ;;  %4077 = vmatpush3.bf16.msra.mxu1 %v4076_v41  ;;  %v3417_v6 = vld [vmem:[%s4939_s12] ss:$0 sm:$0xff]  ;;  %vm3308_vm3 = vcmask 25600  }
 0xa16   :  { %v3221_v42 = vpop.f32.mrb[36].mxu1 }
 0xa17   :  { %v3222_v23 = vadd.f32 %v3415_v21, %v3221_v42  ;;  %v3885_v20 = vpop.f32.mrb[37].mxu1 }
 0xa19   :  { %v3225_v43 = vmax.f32 %v3222_v23, 0.0 }
 0xa1b   :  { %3891 = vmatmul.mubr.msk.f32.vlgmr.msra.gmra.mrb[38].mxu1 %vm1384_vm4, %v3225_v43 }
 0xaee   :  { %v3304_v44 = vpop.f32.mrb[38].mxu1 }
 0xaef   :  { %v3305_v45 = vadd.f32 %v3417_v6, %v3304_v44  ;;  %v3892_v46 = vpop.f32.mrb[39].mxu1 }
 0xaf1   :  { %3309 = vst.msk [vmem:[#allocation2] sm:$0x3] %vm3308_vm3, %v3305_v45 }
 0xaf2   :  { %4120 = shalt.err (!%p4117_p4)
}
 0xaf3   :  { %s4121_s28 = scalar_lea.hbm %s4940_s13, 32 }
 0xaf4   :  { %p4122_p5 = scmp.ne.s32.totalorder %s4940_s13, %s4121_s28  ;;  %p4125_p6 = scmp.lt.u32.totalorder %s4121_s28, %s4940_s13 }
 0xaf6   :  { %p4127_p7 = pnand %p4125_p6, %p4122_p5 }
 0xaf8   :  { %4130 = shalt.err (!%p4127_p7)
}
 0xaf9   :  { %3319 = dma.vmem_to_hbm [thread:$0]  %s3317_s3, 32, %s4940_s13, [#allocation3]  }
 0xafa   :  { %4131 = dma.done.wait [#allocation3], 32  }
 0xafb   :  { %4132 = vsyncadd [#allocation3], 4294967264 }
 0xafc   :  { %3323 = vsyncpa [#allocation3], 1 }

</bundles_post_ra>
